<compile_context>
chip_gen: v5e
topology: v5e:2x2
jax: 0.10.0
libtpu: 0.0.40
codegen_flags: <defaults>
</compile_context>

<pallas_src>
import functools
import numpy as np

import jax
import jax.numpy as jnp
from jax import lax
from jax.experimental import pallas as pl
from jax.experimental.pallas import tpu as pltpu

# ----------------------------- configuration --------------------------------
B = 2            # batch
S = 8            # source sequence length
T = 6            # target length (tgt_len); decoder runs T-1 steps
HENC = 48        # encoder hidden size (encoder.config.hidden_size)
HDEC = 32        # decoder hidden size
EMB = 32         # tgt embedding dim
SRC_VOCAB = 32
TGT_VOCAB = 64
VPAD = 128       # lane-dense padded vocab width for the kernel's logits output
MAX_LAYER = 3    # -> MAX_LAYER + 1 hidden layers fed to ScalarMix
NUM_LAYERS_MIX = MAX_LAYER + 1
SRC_PAD = 0
TGT_PAD = 0      # embeddings.tgt.padding_idx (ignore_index for the loss)


# =============================================================================
# Fused kernel: ScalarMix + span extraction + 2-layer LSTM decoder + vocab
#               projection (lane-dense) + masked cross-entropy loss
# =============================================================================
def fused_definition_probing_kernel(
        hs_ref, mixw_ref, gamma_ref, watt_ref, batt_ref, spans_ref,
        emb_ref, tgt_ref,
        wproj_ref, bproj_ref,
        wih0_ref, b0_ref, whh0_ref,
        wih1_ref, whh1_ref, b1_ref,
        wout_ref, bout_ref,
        logits_ref, loss_ref,
        h1_buf,
        *, hidden, batch, steps, pad_idx):
    L, Bk, Sk, H = hs_ref.shape

    # ---------------- prologue: ScalarMix (softmaxed weights from glue) ------
    mixed = jnp.zeros((Bk, Sk, H), jnp.float32)
    for l in range(L):
        mixed = mixed + mixw_ref[l] * hs_ref[l]
    mixed = gamma_ref[0] * mixed

    # SelfAttentiveSpanExtractor: per-token logit = <h, w_att> + b_att, masked
    # softmax over the span (AllenNLP masked_softmax, memory_efficient=False).
    att = jnp.sum(mixed * watt_ref[...].reshape(1, 1, H), axis=-1) + batt_ref[0]   # (B, S)
    pos = lax.broadcasted_iota(jnp.int32, (Bk, Sk), 1)
    starts = spans_ref[:, 0:1]                      # (B, 1) inclusive
    ends = spans_ref[:, 1:2]                        # (B, 1) inclusive
    mask = jnp.logical_and(pos >= starts, pos <= ends).astype(jnp.float32)
    p = jax.nn.softmax(att * mask, axis=-1)
    p = p * mask
    p = p / (jnp.sum(p, axis=-1, keepdims=True) + 1e-13)
    span_rep = jnp.sum(mixed * p[..., None], axis=1)                               # (B, HENC)

    # init_state: h = c = encoder_hidden_proj(span_representation) for BOTH layers.
    init = (jnp.dot(span_rep, wproj_ref[...], preferred_element_type=jnp.float32)
            + bproj_ref[...])                                                      # (B, HDEC)

    # Hoisted, non-recurrent layer-0 x-path (teacher-forced embeddings; eval mode
    # so no sampling, dropout = identity).  Independent of the recurrence -> off
    # the serial critical path.
    wih0 = wih0_ref[...]
    b0 = b0_ref[...]
    xw0 = [jnp.dot(emb_ref[t], wih0, preferred_element_type=jnp.float32) + b0
           for t in range(steps)]                                                  # steps x (B, 4H)

    whh0 = whh0_ref[...]
    wih1 = wih1_ref[...]
    whh1 = whh1_ref[...]
    b1 = b1_ref[...]

    def lstm_gates(gates, c_prev):
        # PyTorch LSTMCell gate order: i, f, g, o (bias already folded as b_ih + b_hh).
        i = jax.nn.sigmoid(gates[:, 0 * hidden:1 * hidden])
        f = jax.nn.sigmoid(gates[:, 1 * hidden:2 * hidden])
        g = jnp.tanh(gates[:, 2 * hidden:3 * hidden])
        o = jax.nn.sigmoid(gates[:, 3 * hidden:4 * hidden])
        c_new = f * c_prev + i * g
        return o * jnp.tanh(c_new), c_new

    # ---------------- recurrence: fully unrolled (static trip count) ---------
    h0 = init
    c0 = init
    h1 = init
    c1 = init
    for t in range(steps):
        g0 = xw0[t] + jnp.dot(h0, whh0, preferred_element_type=jnp.float32)
        h0, c0 = lstm_gates(g0, c0)
        g1 = (jnp.dot(h0, wih1, preferred_element_type=jnp.float32)
              + jnp.dot(h1, whh1, preferred_element_type=jnp.float32) + b1)
        h1, c1 = lstm_gates(g1, c1)
        h1_buf[pl.ds(t * batch, batch), :] = h1      # stash for batched epilogue

    # ---------------- epilogue: batched vocab projection + masked CE ---------
    h1_all = h1_buf[...]                                                           # (T*B, HDEC)
    logits = (jnp.dot(h1_all, wout_ref[...], preferred_element_type=jnp.float32)
              + bout_ref[...])                                                     # (T*B, VPAD)
    logits_ref[...] = logits                        # lane-dense (last dim = 128) store

    TB, VP = logits.shape
    iota_v = lax.broadcasted_iota(jnp.int32, (TB, VP), 1)
    tgt = tgt_ref[...]                                                             # (T*B, 1) int32
    maxv = jnp.max(logits, axis=-1, keepdims=True)
    lse = maxv + jnp.log(jnp.sum(jnp.exp(logits - maxv), axis=-1, keepdims=True))
    logp = logits - lse
    picked = jnp.sum(jnp.where(iota_v == tgt, logp, 0.0), axis=-1, keepdims=True)  # (T*B, 1)
    valid = (tgt != pad_idx).astype(jnp.float32)
    num = jnp.sum(valid * (-picked), axis=0, keepdims=True)                        # (1, 1)
    den = jnp.maximum(jnp.sum(valid, axis=0, keepdims=True), 1.0)                  # guard all-pad
    loss_ref[...] = num / den


def run_fused_model(p, hs_stack, spans, emb_t, tgt_next_flat):
    Tm1 = emb_t.shape[0]
    vmem = pl.BlockSpec(memory_space=pltpu.MemorySpace.VMEM)
    smem = pl.BlockSpec(memory_space=pltpu.MemorySpace.SMEM)

    # Parameter prep (glue): ScalarMix softmax; vocab padded 64 -> 128 so the
    # kernel's logits output is lane-dense (padded columns get -1e30 bias so they
    # contribute nothing to softmax/argmax/CE).
    mixw = jax.nn.softmax(p["mix_scalars"])
    w_out_pad = jnp.zeros((HDEC, VPAD), jnp.float32).at[:, :TGT_VOCAB].set(p["w_out"])
    b_out_pad = jnp.full((1, VPAD), -1e30, jnp.float32).at[:, :TGT_VOCAB].set(p["b_out"])

    kernel = functools.partial(fused_definition_probing_kernel,
                               hidden=HDEC, batch=B, steps=Tm1, pad_idx=TGT_PAD)

    return pl.pallas_call(
        kernel,
        out_shape=(jax.ShapeDtypeStruct((Tm1 * B, VPAD), jnp.float32),   # logits (t-major rows)
                   jax.ShapeDtypeStruct((1, 1), jnp.float32)),           # scalar loss
        in_specs=[vmem,                       # hidden-layer stack
                  smem, smem,                 # mix weights, gamma
                  vmem, smem,                 # w_att, b_att
                  vmem,                       # spans
                  vmem, vmem,                 # embedded inputs, next-targets
                  vmem, vmem,                 # encoder_hidden_proj
                  vmem, vmem, vmem,           # layer-0 LSTM
                  vmem, vmem, vmem,           # layer-1 LSTM
                  vmem, vmem],                # vocab projection (padded)
        out_specs=(vmem, vmem),
        scratch_shapes=[pltpu.VMEM((Tm1 * B, HDEC), jnp.float32)],       # per-step h1 stash
    )(hs_stack, mixw, p["mix_gamma"], p["w_att"], p["b_att"], spans,
      emb_t, tgt_next_flat,
      p["w_enc_proj"], p["b_enc_proj"],
      p["w_ih0"], p["b0"], p["w_hh0"],
      p["w_ih1"], p["w_hh1"], p["b1"],
      w_out_pad, b_out_pad)


# =============================================================================
# Host-side glue
# =============================================================================
def find_subtensor(sub, seq):
    n = len(sub)
    if n == 0:
        return None
    seq = [int(x) for x in seq]
    sub = [int(x) for x in sub]
    for i in range(len(seq) - n + 1):
        if seq[i:i + n] == sub:
            return [i, i + n - 1]
    return None


def id_extractor_host(span_token_ids, batch, lens, pad_idx):
    # TODO(synk): data-dependent subsequence search has no clean Pallas equivalent;
    # done on host in numpy (matches the PyTorch python loop).
    spans = []
    batch = np.asarray(batch)
    lens = np.asarray(lens)
    for b in range(batch.shape[0]):
        toks = [int(t) for t in np.asarray(span_token_ids)[b] if int(t) != pad_idx][1:-1]
        span = find_subtensor(toks, batch[b])
        if span is None:
            span = find_subtensor(toks[:-1], batch[b])
        if span is None:
            span = [1, int(lens[b]) - 1]
        spans.append(span)
    return jnp.asarray(np.asarray(spans, dtype=np.int32))  # (B, 2), inclusive [start, end]


def synthetic_encoder(p, input_ids, seq_lens):
    # TODO(synk): the injected pretrained HF encoder is external; deterministic
    # multi-layer stand-in producing `all_hidden_layers` is used instead.
    mask = (jnp.arange(S)[None, :] < seq_lens[:, None]).astype(jnp.float32)  # sequence_mask
    h = jnp.take(p["src_emb"], input_ids, axis=0) * mask[..., None]
    layers = [h]
    for W, b in zip(p["enc_ws"], p["enc_bs"]):
        h = jnp.tanh(h @ W + b)
        layers.append(h)
    last_hidden = layers[-1]
    pooled = jnp.tanh(last_hidden[:, 0, :])
    return last_hidden, pooled, tuple(layers), mask


def definition_probing_forward(p, input_ids, seq_lens, span_token_ids, target):
    # encoder
    _, _, all_hidden_layers, _ = synthetic_encoder(p, input_ids, seq_lens)

    # _id_extractor (host)
    span_ids = id_extractor_host(span_token_ids, input_ids, seq_lens, SRC_PAD)

    # ScalarMix over first max_layer+1 layers
    hs_stack = jnp.stack(all_hidden_layers[:MAX_LAYER + 1], axis=0)      # (L, B, S, HENC)

    # decoder inputs (eval mode -> no teacher-forcing sampling, dropout = identity)
    Tm1 = target.shape[1] - 1
    emb_seq = jnp.take(p["tgt_emb"], target[:, :-1], axis=0)             # (B, T-1, E)
    emb_t = jnp.transpose(emb_seq, (1, 0, 2))                            # (T-1, B, E) time-major
    tgt_next = jnp.transpose(target[:, 1:], (1, 0)).reshape(Tm1 * B, 1).astype(jnp.int32)

    logits_pad, loss = run_fused_model(p, hs_stack, span_ids, emb_t, tgt_next)

    # un-pad / reorder in glue (lane-dense slab -> (B, T-1, V)); preds via argmax in glue.
    logits = jnp.transpose(
        logits_pad[:, :TGT_VOCAB].reshape(Tm1, B, TGT_VOCAB), (1, 0, 2))  # (B, T-1, V)
    preds = jnp.argmax(logits, axis=-1)                                   # (B, T-1)
    return preds, logits, loss[0, 0]


def make_params(key):
    ks = jax.random.split(key, 24)

    def rnd(k, shape, scale=0.2):
        return scale * jax.random.normal(k, shape, jnp.float32)

    return {
        # synthetic encoder stand-in
        "src_emb": rnd(ks[0], (SRC_VOCAB, HENC)),
        "enc_ws": [rnd(ks[1 + i], (HENC, HENC)) for i in range(MAX_LAYER)],
        "enc_bs": [rnd(ks[4 + i], (HENC,), 0.05) for i in range(MAX_LAYER)],
        # ScalarMix
        "mix_scalars": rnd(ks[7], (NUM_LAYERS_MIX,), 0.5),
        "mix_gamma": jnp.array([1.0], jnp.float32),
        # SelfAttentiveSpanExtractor global attention (Linear(HENC, 1))
        "w_att": rnd(ks[8], (1, HENC)),
        "b_att": rnd(ks[9], (1,), 0.05),
        # encoder_hidden_proj (HENC != HDEC)
        "w_enc_proj": rnd(ks[10], (HENC, HDEC)),
        "b_enc_proj": rnd(ks[11], (1, HDEC), 0.05),
        # decoder embeddings + 2-layer LSTM (gate order i, f, g, o; b = b_ih + b_hh)
        "tgt_emb": rnd(ks[12], (TGT_VOCAB, EMB)),
        "w_ih0": rnd(ks[13], (EMB, 4 * HDEC)),
        "w_hh0": rnd(ks[14], (HDEC, 4 * HDEC)),
        "b0": rnd(ks[15], (1, 4 * HDEC), 0.05),
        "w_ih1": rnd(ks[16], (HDEC, 4 * HDEC)),
        "w_hh1": rnd(ks[17], (HDEC, 4 * HDEC)),
        "b1": rnd(ks[18], (1, 4 * HDEC), 0.05),
        # vocab projection
        "w_out": rnd(ks[19], (HDEC, TGT_VOCAB)),
        "b_out": rnd(ks[20], (1, TGT_VOCAB), 0.05),
    }


if __name__ == "__main__":
    params = make_params(jax.random.PRNGKey(0))

    input_ids = jnp.array([[3, 7, 12, 9, 5, 11, 4, 6],
                           [8, 2, 14, 10, 3, 9, SRC_PAD, SRC_PAD]], jnp.int32)
    seq_lens = jnp.array([8, 6], jnp.int32)
    # [CLS, tok, tok, SEP, pad, pad]; tokens appear in input -> span found at [2, 3]
    span_token_ids = np.array([[30, 12, 9, 31, 0, 0],
                               [30, 14, 10, 31, 0, 0]], np.int32)
    target = jnp.array([[1, 5, 7, 9, 3, 2],
                        [1, 4, 6, 2, TGT_PAD, TGT_PAD]], jnp.int32)

    preds, logits, loss = definition_probing_forward(
        params, input_ids, seq_lens, span_token_ids, target)
    jax.block_until_ready((preds, logits, loss))

    assert preds.shape == (B, T - 1)
    assert logits.shape == (B, T - 1, TGT_VOCAB)
    assert bool(jnp.all(jnp.isfinite(logits)))
    assert bool(jnp.isfinite(loss))
    print("KERNEL_OK")
</pallas_src>

<mosaic_0001>
module attributes {stable_mosaic.version = 11 : i64} {
  func.func @fused_definition_probing_kernel(%arg0: memref<4x2x8x48xf32, #tpu.memory_space<vmem>>, %arg1: memref<4xf32, #tpu.memory_space<smem>>, %arg2: memref<1xf32, #tpu.memory_space<smem>>, %arg3: memref<1x48xf32, #tpu.memory_space<vmem>>, %arg4: memref<1xf32, #tpu.memory_space<smem>>, %arg5: memref<2x2xi32, #tpu.memory_space<vmem>>, %arg6: memref<5x2x32xf32, #tpu.memory_space<vmem>>, %arg7: memref<10x1xi32, #tpu.memory_space<vmem>>, %arg8: memref<48x32xf32, #tpu.memory_space<vmem>>, %arg9: memref<1x32xf32, #tpu.memory_space<vmem>>, %arg10: memref<32x128xf32, #tpu.memory_space<vmem>>, %arg11: memref<1x128xf32, #tpu.memory_space<vmem>>, %arg12: memref<32x128xf32, #tpu.memory_space<vmem>>, %arg13: memref<32x128xf32, #tpu.memory_space<vmem>>, %arg14: memref<32x128xf32, #tpu.memory_space<vmem>>, %arg15: memref<1x128xf32, #tpu.memory_space<vmem>>, %arg16: memref<32x128xf32, #tpu.memory_space<vmem>>, %arg17: memref<1x128xf32, #tpu.memory_space<vmem>>, %arg18: memref<10x128xf32, #tpu.memory_space<vmem>>, %arg19: memref<1x1xf32, #tpu.memory_space<vmem>>, %arg20: memref<10x32xf32, #tpu.memory_space<vmem>>) attributes {dimension_semantics = [], scalar_prefetch = 0 : i64, scratch_operands = 1 : i64, tpu.core_type = #tpu.core_type<tc>} {
    %cst = arith.constant 0.000000e+00 : f32
    %0 = vector.broadcast %cst : f32 to vector<2x8x48xf32>
    %c0 = arith.constant 0 : index
    %1 = memref.load %arg1[%c0] : memref<4xf32, #tpu.memory_space<smem>>
    %c0_0 = arith.constant 0 : index
    %c0_1 = arith.constant 0 : index
    %c0_2 = arith.constant 0 : index
    %c0_3 = arith.constant 0 : index
    %2 = vector.load %arg0[%c0_0, %c0_1, %c0_2, %c0_3] : memref<4x2x8x48xf32, #tpu.memory_space<vmem>>, vector<1x2x8x48xf32>
    %3 = vector.shape_cast %2 : vector<1x2x8x48xf32> to vector<2x8x48xf32>
    %4 = vector.broadcast %1 : f32 to vector<2x8x48xf32>
    %5 = arith.mulf %4, %3 : vector<2x8x48xf32>
    %6 = arith.addf %0, %5 : vector<2x8x48xf32>
    %c1 = arith.constant 1 : index
    %7 = memref.load %arg1[%c1] : memref<4xf32, #tpu.memory_space<smem>>
    %c1_4 = arith.constant 1 : index
    %c0_5 = arith.constant 0 : index
    %c0_6 = arith.constant 0 : index
    %c0_7 = arith.constant 0 : index
    %8 = vector.load %arg0[%c1_4, %c0_5, %c0_6, %c0_7] : memref<4x2x8x48xf32, #tpu.memory_space<vmem>>, vector<1x2x8x48xf32>
    %9 = vector.shape_cast %8 : vector<1x2x8x48xf32> to vector<2x8x48xf32>
    %10 = vector.broadcast %7 : f32 to vector<2x8x48xf32>
    %11 = arith.mulf %10, %9 : vector<2x8x48xf32>
    %12 = arith.addf %6, %11 : vector<2x8x48xf32>
    %c2 = arith.constant 2 : index
    %13 = memref.load %arg1[%c2] : memref<4xf32, #tpu.memory_space<smem>>
    %c2_8 = arith.constant 2 : index
    %c0_9 = arith.constant 0 : index
    %c0_10 = arith.constant 0 : index
    %c0_11 = arith.constant 0 : index
    %14 = vector.load %arg0[%c2_8, %c0_9, %c0_10, %c0_11] : memref<4x2x8x48xf32, #tpu.memory_space<vmem>>, vector<1x2x8x48xf32>
    %15 = vector.shape_cast %14 : vector<1x2x8x48xf32> to vector<2x8x48xf32>
    %16 = vector.broadcast %13 : f32 to vector<2x8x48xf32>
    %17 = arith.mulf %16, %15 : vector<2x8x48xf32>
    %18 = arith.addf %12, %17 : vector<2x8x48xf32>
    %c3 = arith.constant 3 : index
    %19 = memref.load %arg1[%c3] : memref<4xf32, #tpu.memory_space<smem>>
    %c3_12 = arith.constant 3 : index
    %c0_13 = arith.constant 0 : index
    %c0_14 = arith.constant 0 : index
    %c0_15 = arith.constant 0 : index
    %20 = vector.load %arg0[%c3_12, %c0_13, %c0_14, %c0_15] : memref<4x2x8x48xf32, #tpu.memory_space<vmem>>, vector<1x2x8x48xf32>
    %21 = vector.shape_cast %20 : vector<1x2x8x48xf32> to vector<2x8x48xf32>
    %22 = vector.broadcast %19 : f32 to vector<2x8x48xf32>
    %23 = arith.mulf %22, %21 : vector<2x8x48xf32>
    %24 = arith.addf %18, %23 : vector<2x8x48xf32>
    %c0_16 = arith.constant 0 : index
    %25 = memref.load %arg2[%c0_16] : memref<1xf32, #tpu.memory_space<smem>>
    %26 = vector.broadcast %25 : f32 to vector<2x8x48xf32>
    %27 = arith.mulf %26, %24 : vector<2x8x48xf32>
    %c0_17 = arith.constant 0 : index
    %c0_18 = arith.constant 0 : index
    %28 = vector.load %arg3[%c0_17, %c0_18] : memref<1x48xf32, #tpu.memory_space<vmem>>, vector<1x48xf32>
    %29 = vector.shape_cast %28 : vector<1x48xf32> to vector<1x1x48xf32>
    %30 = vector.broadcast %29 : vector<1x1x48xf32> to vector<2x8x48xf32>
    %31 = arith.mulf %27, %30 : vector<2x8x48xf32>
    %cst_19 = arith.constant dense<0.000000e+00> : vector<2x8xf32>
    %32 = vector.multi_reduction <add>, %31, %cst_19 [2] : vector<2x8x48xf32> to vector<2x8xf32>
    %c0_20 = arith.constant 0 : index
    %33 = memref.load %arg4[%c0_20] : memref<1xf32, #tpu.memory_space<smem>>
    %34 = vector.broadcast %33 : f32 to vector<2x8xf32>
    %35 = arith.addf %32, %34 : vector<2x8xf32>
    %36 = tpu.iota {dimensions = array<i32: 1>} : vector<2x8xi32>
    %c0_21 = arith.constant 0 : index
    %c0_22 = arith.constant 0 : index
    %37 = vector.load %arg5[%c0_21, %c0_22] : memref<2x2xi32, #tpu.memory_space<vmem>>, vector<2x1xi32>
    %c0_23 = arith.constant 0 : index
    %c1_24 = arith.constant 1 : index
    %38 = vector.load %arg5[%c0_23, %c1_24] : memref<2x2xi32, #tpu.memory_space<vmem>>, vector<2x1xi32>
    %39 = vector.broadcast %37 : vector<2x1xi32> to vector<2x8xi32>
    %40 = arith.cmpi sge, %36, %39 : vector<2x8xi32>
    %41 = vector.broadcast %38 : vector<2x1xi32> to vector<2x8xi32>
    %42 = arith.cmpi sle, %36, %41 : vector<2x8xi32>
    %43 = arith.andi %40, %42 : vector<2x8xi1>
    %44 = arith.extui %43 : vector<2x8xi1> to vector<2x8xi32>
    %45 = arith.sitofp %44 : vector<2x8xi32> to vector<2x8xf32>
    %46 = arith.mulf %35, %45 : vector<2x8xf32>
    %cst_25 = arith.constant dense<0xFF800000> : vector<2xf32>
    %47 = vector.multi_reduction <maximumf>, %46, %cst_25 [1] : vector<2x8xf32> to vector<2xf32>
    %cst_26 = arith.constant 0xFF800000 : f32
    %48 = vector.broadcast %cst_26 : f32 to vector<2xf32>
    %49 = arith.maximumf %48, %47 : vector<2xf32>
    %50 = vector.shape_cast %49 : vector<2xf32> to vector<2x1xf32>
    %51 = vector.broadcast %50 : vector<2x1xf32> to vector<2x8xf32>
    %52 = arith.subf %46, %51 : vector<2x8xf32>
    %53 = math.exp %52 : vector<2x8xf32>
    %cst_27 = arith.constant dense<0.000000e+00> : vector<2xf32>
    %54 = vector.multi_reduction <add>, %53, %cst_27 [1] : vector<2x8xf32> to vector<2xf32>
    %55 = vector.shape_cast %54 : vector<2xf32> to vector<2x1xf32>
    %56 = vector.broadcast %55 : vector<2x1xf32> to vector<2x8xf32>
    %57 = arith.divf %53, %56 : vector<2x8xf32>
    %58 = arith.mulf %57, %45 : vector<2x8xf32>
    %cst_28 = arith.constant dense<0.000000e+00> : vector<2xf32>
    %59 = vector.multi_reduction <add>, %58, %cst_28 [1] : vector<2x8xf32> to vector<2xf32>
    %60 = vector.shape_cast %59 : vector<2xf32> to vector<2x1xf32>
    %cst_29 = arith.constant 9.99999982E-14 : f32
    %61 = vector.broadcast %cst_29 : f32 to vector<2x1xf32>
    %62 = arith.addf %60, %61 : vector<2x1xf32>
    %63 = vector.broadcast %62 : vector<2x1xf32> to vector<2x8xf32>
    %64 = arith.divf %58, %63 : vector<2x8xf32>
    %65 = vector.shape_cast %64 : vector<2x8xf32> to vector<2x8x1xf32>
    %66 = vector.broadcast %65 : vector<2x8x1xf32> to vector<2x8x48xf32>
    %67 = arith.mulf %27, %66 : vector<2x8x48xf32>
    %cst_30 = arith.constant dense<0.000000e+00> : vector<2x48xf32>
    %68 = vector.multi_reduction <add>, %67, %cst_30 [1] : vector<2x8x48xf32> to vector<2x48xf32>
    %c0_31 = arith.constant 0 : index
    %c0_32 = arith.constant 0 : index
    %69 = vector.load %arg8[%c0_31, %c0_32] : memref<48x32xf32, #tpu.memory_space<vmem>>, vector<48x32xf32>
    %cst_33 = arith.constant dense<0.000000e+00> : vector<2x32xf32>
    %70 = tpu.matmul %68, %69, %cst_33 {dimension_numbers = #tpu.dot_dimension_numbers<[1], [0], [0], [1], [0, 0, 1, 1], [], []>} : vector<2x48xf32>, vector<48x32xf32>, vector<2x32xf32> -> vector<2x32xf32>
    %c0_34 = arith.constant 0 : index
    %c0_35 = arith.constant 0 : index
    %71 = vector.load %arg9[%c0_34, %c0_35] : memref<1x32xf32, #tpu.memory_space<vmem>>, vector<1x32xf32>
    %72 = vector.broadcast %71 : vector<1x32xf32> to vector<2x32xf32>
    %73 = arith.addf %70, %72 : vector<2x32xf32>
    %c0_36 = arith.constant 0 : index
    %c0_37 = arith.constant 0 : index
    %74 = vector.load %arg10[%c0_36, %c0_37] : memref<32x128xf32, #tpu.memory_space<vmem>>, vector<32x128xf32>
    %c0_38 = arith.constant 0 : index
    %c0_39 = arith.constant 0 : index
    %75 = vector.load %arg11[%c0_38, %c0_39] : memref<1x128xf32, #tpu.memory_space<vmem>>, vector<1x128xf32>
    %c0_40 = arith.constant 0 : index
    %c0_41 = arith.constant 0 : index
    %c0_42 = arith.constant 0 : index
    %76 = vector.load %arg6[%c0_40, %c0_41, %c0_42] : memref<5x2x32xf32, #tpu.memory_space<vmem>>, vector<1x2x32xf32>
    %77 = vector.shape_cast %76 : vector<1x2x32xf32> to vector<2x32xf32>
    %cst_43 = arith.constant dense<0.000000e+00> : vector<2x128xf32>
    %78 = tpu.matmul %77, %74, %cst_43 {dimension_numbers = #tpu.dot_dimension_numbers<[1], [0], [0], [1], [0, 0, 1, 1], [], []>} : vector<2x32xf32>, vector<32x128xf32>, vector<2x128xf32> -> vector<2x128xf32>
    %79 = vector.broadcast %75 : vector<1x128xf32> to vector<2x128xf32>
    %80 = arith.addf %78, %79 : vector<2x128xf32>
    %c1_44 = arith.constant 1 : index
    %c0_45 = arith.constant 0 : index
    %c0_46 = arith.constant 0 : index
    %81 = vector.load %arg6[%c1_44, %c0_45, %c0_46] : memref<5x2x32xf32, #tpu.memory_space<vmem>>, vector<1x2x32xf32>
    %82 = vector.shape_cast %81 : vector<1x2x32xf32> to vector<2x32xf32>
    %cst_47 = arith.constant dense<0.000000e+00> : vector<2x128xf32>
    %83 = tpu.matmul %82, %74, %cst_47 {dimension_numbers = #tpu.dot_dimension_numbers<[1], [0], [0], [1], [0, 0, 1, 1], [], []>} : vector<2x32xf32>, vector<32x128xf32>, vector<2x128xf32> -> vector<2x128xf32>
    %84 = vector.broadcast %75 : vector<1x128xf32> to vector<2x128xf32>
    %85 = arith.addf %83, %84 : vector<2x128xf32>
    %c2_48 = arith.constant 2 : index
    %c0_49 = arith.constant 0 : index
    %c0_50 = arith.constant 0 : index
    %86 = vector.load %arg6[%c2_48, %c0_49, %c0_50] : memref<5x2x32xf32, #tpu.memory_space<vmem>>, vector<1x2x32xf32>
    %87 = vector.shape_cast %86 : vector<1x2x32xf32> to vector<2x32xf32>
    %cst_51 = arith.constant dense<0.000000e+00> : vector<2x128xf32>
    %88 = tpu.matmul %87, %74, %cst_51 {dimension_numbers = #tpu.dot_dimension_numbers<[1], [0], [0], [1], [0, 0, 1, 1], [], []>} : vector<2x32xf32>, vector<32x128xf32>, vector<2x128xf32> -> vector<2x128xf32>
    %89 = vector.broadcast %75 : vector<1x128xf32> to vector<2x128xf32>
    %90 = arith.addf %88, %89 : vector<2x128xf32>
    %c3_52 = arith.constant 3 : index
    %c0_53 = arith.constant 0 : index
    %c0_54 = arith.constant 0 : index
    %91 = vector.load %arg6[%c3_52, %c0_53, %c0_54] : memref<5x2x32xf32, #tpu.memory_space<vmem>>, vector<1x2x32xf32>
    %92 = vector.shape_cast %91 : vector<1x2x32xf32> to vector<2x32xf32>
    %cst_55 = arith.constant dense<0.000000e+00> : vector<2x128xf32>
    %93 = tpu.matmul %92, %74, %cst_55 {dimension_numbers = #tpu.dot_dimension_numbers<[1], [0], [0], [1], [0, 0, 1, 1], [], []>} : vector<2x32xf32>, vector<32x128xf32>, vector<2x128xf32> -> vector<2x128xf32>
    %94 = vector.broadcast %75 : vector<1x128xf32> to vector<2x128xf32>
    %95 = arith.addf %93, %94 : vector<2x128xf32>
    %c4 = arith.constant 4 : index
    %c0_56 = arith.constant 0 : index
    %c0_57 = arith.constant 0 : index
    %96 = vector.load %arg6[%c4, %c0_56, %c0_57] : memref<5x2x32xf32, #tpu.memory_space<vmem>>, vector<1x2x32xf32>
    %97 = vector.shape_cast %96 : vector<1x2x32xf32> to vector<2x32xf32>
    %cst_58 = arith.constant dense<0.000000e+00> : vector<2x128xf32>
    %98 = tpu.matmul %97, %74, %cst_58 {dimension_numbers = #tpu.dot_dimension_numbers<[1], [0], [0], [1], [0, 0, 1, 1], [], []>} : vector<2x32xf32>, vector<32x128xf32>, vector<2x128xf32> -> vector<2x128xf32>
    %99 = vector.broadcast %75 : vector<1x128xf32> to vector<2x128xf32>
    %100 = arith.addf %98, %99 : vector<2x128xf32>
    %c0_59 = arith.constant 0 : index
    %c0_60 = arith.constant 0 : index
    %101 = vector.load %arg12[%c0_59, %c0_60] : memref<32x128xf32, #tpu.memory_space<vmem>>, vector<32x128xf32>
    %c0_61 = arith.constant 0 : index
    %c0_62 = arith.constant 0 : index
    %102 = vector.load %arg13[%c0_61, %c0_62] : memref<32x128xf32, #tpu.memory_space<vmem>>, vector<32x128xf32>
    %c0_63 = arith.constant 0 : index
    %c0_64 = arith.constant 0 : index
    %103 = vector.load %arg14[%c0_63, %c0_64] : memref<32x128xf32, #tpu.memory_space<vmem>>, vector<32x128xf32>
    %c0_65 = arith.constant 0 : index
    %c0_66 = arith.constant 0 : index
    %104 = vector.load %arg15[%c0_65, %c0_66] : memref<1x128xf32, #tpu.memory_space<vmem>>, vector<1x128xf32>
    %cst_67 = arith.constant dense<0.000000e+00> : vector<2x128xf32>
    %105 = tpu.matmul %73, %101, %cst_67 {dimension_numbers = #tpu.dot_dimension_numbers<[1], [0], [0], [1], [0, 0, 1, 1], [], []>} : vector<2x32xf32>, vector<32x128xf32>, vector<2x128xf32> -> vector<2x128xf32>
    %106 = arith.addf %80, %105 : vector<2x128xf32>
    %107 = vector.extract_strided_slice %106 {offsets = [0, 0], sizes = [2, 32], strides = [1, 1]} : vector<2x128xf32> to vector<2x32xf32>
    %108 = arith.negf %107 : vector<2x32xf32>
    %109 = math.exp %108 : vector<2x32xf32>
    %cst_68 = arith.constant 1.000000e+00 : f32
    %110 = vector.broadcast %cst_68 : f32 to vector<2x32xf32>
    %111 = arith.addf %110, %109 : vector<2x32xf32>
    %112 = arith.divf %110, %111 : vector<2x32xf32>
    %113 = vector.extract_strided_slice %106 {offsets = [0, 32], sizes = [2, 32], strides = [1, 1]} : vector<2x128xf32> to vector<2x32xf32>
    %114 = arith.negf %113 : vector<2x32xf32>
    %115 = math.exp %114 : vector<2x32xf32>
    %cst_69 = arith.constant 1.000000e+00 : f32
    %116 = vector.broadcast %cst_69 : f32 to vector<2x32xf32>
    %117 = arith.addf %116, %115 : vector<2x32xf32>
    %118 = arith.divf %116, %117 : vector<2x32xf32>
    %119 = vector.extract_strided_slice %106 {offsets = [0, 64], sizes = [2, 32], strides = [1, 1]} : vector<2x128xf32> to vector<2x32xf32>
    %120 = math.tanh %119 : vector<2x32xf32>
    %121 = vector.extract_strided_slice %106 {offsets = [0, 96], sizes = [2, 32], strides = [1, 1]} : vector<2x128xf32> to vector<2x32xf32>
    %122 = arith.negf %121 : vector<2x32xf32>
    %123 = math.exp %122 : vector<2x32xf32>
    %cst_70 = arith.constant 1.000000e+00 : f32
    %124 = vector.broadcast %cst_70 : f32 to vector<2x32xf32>
    %125 = arith.addf %124, %123 : vector<2x32xf32>
    %126 = arith.divf %124, %125 : vector<2x32xf32>
    %127 = arith.mulf %118, %73 : vector<2x32xf32>
    %128 = arith.mulf %112, %120 : vector<2x32xf32>
    %129 = arith.addf %127, %128 : vector<2x32xf32>
    %130 = math.tanh %129 : vector<2x32xf32>
    %131 = arith.mulf %126, %130 : vector<2x32xf32>
    %cst_71 = arith.constant dense<0.000000e+00> : vector<2x128xf32>
    %132 = tpu.matmul %131, %102, %cst_71 {dimension_numbers = #tpu.dot_dimension_numbers<[1], [0], [0], [1], [0, 0, 1, 1], [], []>} : vector<2x32xf32>, vector<32x128xf32>, vector<2x128xf32> -> vector<2x128xf32>
    %cst_72 = arith.constant dense<0.000000e+00> : vector<2x128xf32>
    %133 = tpu.matmul %73, %103, %cst_72 {dimension_numbers = #tpu.dot_dimension_numbers<[1], [0], [0], [1], [0, 0, 1, 1], [], []>} : vector<2x32xf32>, vector<32x128xf32>, vector<2x128xf32> -> vector<2x128xf32>
    %134 = arith.addf %132, %133 : vector<2x128xf32>
    %135 = vector.broadcast %104 : vector<1x128xf32> to vector<2x128xf32>
    %136 = arith.addf %134, %135 : vector<2x128xf32>
    %137 = vector.extract_strided_slice %136 {offsets = [0, 0], sizes = [2, 32], strides = [1, 1]} : vector<2x128xf32> to vector<2x32xf32>
    %138 = arith.negf %137 : vector<2x32xf32>
    %139 = math.exp %138 : vector<2x32xf32>
    %cst_73 = arith.constant 1.000000e+00 : f32
    %140 = vector.broadcast %cst_73 : f32 to vector<2x32xf32>
    %141 = arith.addf %140, %139 : vector<2x32xf32>
    %142 = arith.divf %140, %141 : vector<2x32xf32>
    %143 = vector.extract_strided_slice %136 {offsets = [0, 32], sizes = [2, 32], strides = [1, 1]} : vector<2x128xf32> to vector<2x32xf32>
    %144 = arith.negf %143 : vector<2x32xf32>
    %145 = math.exp %144 : vector<2x32xf32>
    %cst_74 = arith.constant 1.000000e+00 : f32
    %146 = vector.broadcast %cst_74 : f32 to vector<2x32xf32>
    %147 = arith.addf %146, %145 : vector<2x32xf32>
    %148 = arith.divf %146, %147 : vector<2x32xf32>
    %149 = vector.extract_strided_slice %136 {offsets = [0, 64], sizes = [2, 32], strides = [1, 1]} : vector<2x128xf32> to vector<2x32xf32>
    %150 = math.tanh %149 : vector<2x32xf32>
    %151 = vector.extract_strided_slice %136 {offsets = [0, 96], sizes = [2, 32], strides = [1, 1]} : vector<2x128xf32> to vector<2x32xf32>
    %152 = arith.negf %151 : vector<2x32xf32>
    %153 = math.exp %152 : vector<2x32xf32>
    %cst_75 = arith.constant 1.000000e+00 : f32
    %154 = vector.broadcast %cst_75 : f32 to vector<2x32xf32>
    %155 = arith.addf %154, %153 : vector<2x32xf32>
    %156 = arith.divf %154, %155 : vector<2x32xf32>
    %157 = arith.mulf %148, %73 : vector<2x32xf32>
    %158 = arith.mulf %142, %150 : vector<2x32xf32>
    %159 = arith.addf %157, %158 : vector<2x32xf32>
    %160 = math.tanh %159 : vector<2x32xf32>
    %161 = arith.mulf %156, %160 : vector<2x32xf32>
    %c0_76 = arith.constant 0 : index
    %c0_77 = arith.constant 0 : index
    %162 = vector.load %arg20[%c0_76, %c0_77] : memref<10x32xf32, #tpu.memory_space<vmem>>, vector<2x32xf32>
    tpu.vector_store %arg20[%c0_76, %c0_77], %161 {strides = array<i32>} : memref<10x32xf32, #tpu.memory_space<vmem>>, vector<2x32xf32>,
    %cst_78 = arith.constant dense<0.000000e+00> : vector<2x128xf32>
    %163 = tpu.matmul %131, %101, %cst_78 {dimension_numbers = #tpu.dot_dimension_numbers<[1], [0], [0], [1], [0, 0, 1, 1], [], []>} : vector<2x32xf32>, vector<32x128xf32>, vector<2x128xf32> -> vector<2x128xf32>
    %164 = arith.addf %85, %163 : vector<2x128xf32>
    %165 = vector.extract_strided_slice %164 {offsets = [0, 0], sizes = [2, 32], strides = [1, 1]} : vector<2x128xf32> to vector<2x32xf32>
    %166 = arith.negf %165 : vector<2x32xf32>
    %167 = math.exp %166 : vector<2x32xf32>
    %cst_79 = arith.constant 1.000000e+00 : f32
    %168 = vector.broadcast %cst_79 : f32 to vector<2x32xf32>
    %169 = arith.addf %168, %167 : vector<2x32xf32>
    %170 = arith.divf %168, %169 : vector<2x32xf32>
    %171 = vector.extract_strided_slice %164 {offsets = [0, 32], sizes = [2, 32], strides = [1, 1]} : vector<2x128xf32> to vector<2x32xf32>
    %172 = arith.negf %171 : vector<2x32xf32>
    %173 = math.exp %172 : vector<2x32xf32>
    %cst_80 = arith.constant 1.000000e+00 : f32
    %174 = vector.broadcast %cst_80 : f32 to vector<2x32xf32>
    %175 = arith.addf %174, %173 : vector<2x32xf32>
    %176 = arith.divf %174, %175 : vector<2x32xf32>
    %177 = vector.extract_strided_slice %164 {offsets = [0, 64], sizes = [2, 32], strides = [1, 1]} : vector<2x128xf32> to vector<2x32xf32>
    %178 = math.tanh %177 : vector<2x32xf32>
    %179 = vector.extract_strided_slice %164 {offsets = [0, 96], sizes = [2, 32], strides = [1, 1]} : vector<2x128xf32> to vector<2x32xf32>
    %180 = arith.negf %179 : vector<2x32xf32>
    %181 = math.exp %180 : vector<2x32xf32>
    %cst_81 = arith.constant 1.000000e+00 : f32
    %182 = vector.broadcast %cst_81 : f32 to vector<2x32xf32>
    %183 = arith.addf %182, %181 : vector<2x32xf32>
    %184 = arith.divf %182, %183 : vector<2x32xf32>
    %185 = arith.mulf %176, %129 : vector<2x32xf32>
    %186 = arith.mulf %170, %178 : vector<2x32xf32>
    %187 = arith.addf %185, %186 : vector<2x32xf32>
    %188 = math.tanh %187 : vector<2x32xf32>
    %189 = arith.mulf %184, %188 : vector<2x32xf32>
    %cst_82 = arith.constant dense<0.000000e+00> : vector<2x128xf32>
    %190 = tpu.matmul %189, %102, %cst_82 {dimension_numbers = #tpu.dot_dimension_numbers<[1], [0], [0], [1], [0, 0, 1, 1], [], []>} : vector<2x32xf32>, vector<32x128xf32>, vector<2x128xf32> -> vector<2x128xf32>
    %cst_83 = arith.constant dense<0.000000e+00> : vector<2x128xf32>
    %191 = tpu.matmul %161, %103, %cst_83 {dimension_numbers = #tpu.dot_dimension_numbers<[1], [0], [0], [1], [0, 0, 1, 1], [], []>} : vector<2x32xf32>, vector<32x128xf32>, vector<2x128xf32> -> vector<2x128xf32>
    %192 = arith.addf %190, %191 : vector<2x128xf32>
    %193 = vector.broadcast %104 : vector<1x128xf32> to vector<2x128xf32>
    %194 = arith.addf %192, %193 : vector<2x128xf32>
    %195 = vector.extract_strided_slice %194 {offsets = [0, 0], sizes = [2, 32], strides = [1, 1]} : vector<2x128xf32> to vector<2x32xf32>
    %196 = arith.negf %195 : vector<2x32xf32>
    %197 = math.exp %196 : vector<2x32xf32>
    %cst_84 = arith.constant 1.000000e+00 : f32
    %198 = vector.broadcast %cst_84 : f32 to vector<2x32xf32>
    %199 = arith.addf %198, %197 : vector<2x32xf32>
    %200 = arith.divf %198, %199 : vector<2x32xf32>
    %201 = vector.extract_strided_slice %194 {offsets = [0, 32], sizes = [2, 32], strides = [1, 1]} : vector<2x128xf32> to vector<2x32xf32>
    %202 = arith.negf %201 : vector<2x32xf32>
    %203 = math.exp %202 : vector<2x32xf32>
    %cst_85 = arith.constant 1.000000e+00 : f32
    %204 = vector.broadcast %cst_85 : f32 to vector<2x32xf32>
    %205 = arith.addf %204, %203 : vector<2x32xf32>
    %206 = arith.divf %204, %205 : vector<2x32xf32>
    %207 = vector.extract_strided_slice %194 {offsets = [0, 64], sizes = [2, 32], strides = [1, 1]} : vector<2x128xf32> to vector<2x32xf32>
    %208 = math.tanh %207 : vector<2x32xf32>
    %209 = vector.extract_strided_slice %194 {offsets = [0, 96], sizes = [2, 32], strides = [1, 1]} : vector<2x128xf32> to vector<2x32xf32>
    %210 = arith.negf %209 : vector<2x32xf32>
    %211 = math.exp %210 : vector<2x32xf32>
    %cst_86 = arith.constant 1.000000e+00 : f32
    %212 = vector.broadcast %cst_86 : f32 to vector<2x32xf32>
    %213 = arith.addf %212, %211 : vector<2x32xf32>
    %214 = arith.divf %212, %213 : vector<2x32xf32>
    %215 = arith.mulf %206, %159 : vector<2x32xf32>
    %216 = arith.mulf %200, %208 : vector<2x32xf32>
    %217 = arith.addf %215, %216 : vector<2x32xf32>
    %218 = math.tanh %217 : vector<2x32xf32>
    %219 = arith.mulf %214, %218 : vector<2x32xf32>
    %c2_87 = arith.constant 2 : index
    %c0_88 = arith.constant 0 : index
    %220 = vector.load %arg20[%c2_87, %c0_88] : memref<10x32xf32, #tpu.memory_space<vmem>>, vector<2x32xf32>
    tpu.vector_store %arg20[%c2_87, %c0_88], %219 {strides = array<i32>} : memref<10x32xf32, #tpu.memory_space<vmem>>, vector<2x32xf32>,
    %cst_89 = arith.constant dense<0.000000e+00> : vector<2x128xf32>
    %221 = tpu.matmul %189, %101, %cst_89 {dimension_numbers = #tpu.dot_dimension_numbers<[1], [0], [0], [1], [0, 0, 1, 1], [], []>} : vector<2x32xf32>, vector<32x128xf32>, vector<2x128xf32> -> vector<2x128xf32>
    %222 = arith.addf %90, %221 : vector<2x128xf32>
    %223 = vector.extract_strided_slice %222 {offsets = [0, 0], sizes = [2, 32], strides = [1, 1]} : vector<2x128xf32> to vector<2x32xf32>
    %224 = arith.negf %223 : vector<2x32xf32>
    %225 = math.exp %224 : vector<2x32xf32>
    %cst_90 = arith.constant 1.000000e+00 : f32
    %226 = vector.broadcast %cst_90 : f32 to vector<2x32xf32>
    %227 = arith.addf %226, %225 : vector<2x32xf32>
    %228 = arith.divf %226, %227 : vector<2x32xf32>
    %229 = vector.extract_strided_slice %222 {offsets = [0, 32], sizes = [2, 32], strides = [1, 1]} : vector<2x128xf32> to vector<2x32xf32>
    %230 = arith.negf %229 : vector<2x32xf32>
    %231 = math.exp %230 : vector<2x32xf32>
    %cst_91 = arith.constant 1.000000e+00 : f32
    %232 = vector.broadcast %cst_91 : f32 to vector<2x32xf32>
    %233 = arith.addf %232, %231 : vector<2x32xf32>
    %234 = arith.divf %232, %233 : vector<2x32xf32>
    %235 = vector.extract_strided_slice %222 {offsets = [0, 64], sizes = [2, 32], strides = [1, 1]} : vector<2x128xf32> to vector<2x32xf32>
    %236 = math.tanh %235 : vector<2x32xf32>
    %237 = vector.extract_strided_slice %222 {offsets = [0, 96], sizes = [2, 32], strides = [1, 1]} : vector<2x128xf32> to vector<2x32xf32>
    %238 = arith.negf %237 : vector<2x32xf32>
    %239 = math.exp %238 : vector<2x32xf32>
    %cst_92 = arith.constant 1.000000e+00 : f32
    %240 = vector.broadcast %cst_92 : f32 to vector<2x32xf32>
    %241 = arith.addf %240, %239 : vector<2x32xf32>
    %242 = arith.divf %240, %241 : vector<2x32xf32>
    %243 = arith.mulf %234, %187 : vector<2x32xf32>
    %244 = arith.mulf %228, %236 : vector<2x32xf32>
    %245 = arith.addf %243, %244 : vector<2x32xf32>
    %246 = math.tanh %245 : vector<2x32xf32>
    %247 = arith.mulf %242, %246 : vector<2x32xf32>
    %cst_93 = arith.constant dense<0.000000e+00> : vector<2x128xf32>
    %248 = tpu.matmul %247, %102, %cst_93 {dimension_numbers = #tpu.dot_dimension_numbers<[1], [0], [0], [1], [0, 0, 1, 1], [], []>} : vector<2x32xf32>, vector<32x128xf32>, vector<2x128xf32> -> vector<2x128xf32>
    %cst_94 = arith.constant dense<0.000000e+00> : vector<2x128xf32>
    %249 = tpu.matmul %219, %103, %cst_94 {dimension_numbers = #tpu.dot_dimension_numbers<[1], [0], [0], [1], [0, 0, 1, 1], [], []>} : vector<2x32xf32>, vector<32x128xf32>, vector<2x128xf32> -> vector<2x128xf32>
    %250 = arith.addf %248, %249 : vector<2x128xf32>
    %251 = vector.broadcast %104 : vector<1x128xf32> to vector<2x128xf32>
    %252 = arith.addf %250, %251 : vector<2x128xf32>
    %253 = vector.extract_strided_slice %252 {offsets = [0, 0], sizes = [2, 32], strides = [1, 1]} : vector<2x128xf32> to vector<2x32xf32>
    %254 = arith.negf %253 : vector<2x32xf32>
    %255 = math.exp %254 : vector<2x32xf32>
    %cst_95 = arith.constant 1.000000e+00 : f32
    %256 = vector.broadcast %cst_95 : f32 to vector<2x32xf32>
    %257 = arith.addf %256, %255 : vector<2x32xf32>
    %258 = arith.divf %256, %257 : vector<2x32xf32>
    %259 = vector.extract_strided_slice %252 {offsets = [0, 32], sizes = [2, 32], strides = [1, 1]} : vector<2x128xf32> to vector<2x32xf32>
    %260 = arith.negf %259 : vector<2x32xf32>
    %261 = math.exp %260 : vector<2x32xf32>
    %cst_96 = arith.constant 1.000000e+00 : f32
    %262 = vector.broadcast %cst_96 : f32 to vector<2x32xf32>
    %263 = arith.addf %262, %261 : vector<2x32xf32>
    %264 = arith.divf %262, %263 : vector<2x32xf32>
    %265 = vector.extract_strided_slice %252 {offsets = [0, 64], sizes = [2, 32], strides = [1, 1]} : vector<2x128xf32> to vector<2x32xf32>
    %266 = math.tanh %265 : vector<2x32xf32>
    %267 = vector.extract_strided_slice %252 {offsets = [0, 96], sizes = [2, 32], strides = [1, 1]} : vector<2x128xf32> to vector<2x32xf32>
    %268 = arith.negf %267 : vector<2x32xf32>
    %269 = math.exp %268 : vector<2x32xf32>
    %cst_97 = arith.constant 1.000000e+00 : f32
    %270 = vector.broadcast %cst_97 : f32 to vector<2x32xf32>
    %271 = arith.addf %270, %269 : vector<2x32xf32>
    %272 = arith.divf %270, %271 : vector<2x32xf32>
    %273 = arith.mulf %264, %217 : vector<2x32xf32>
    %274 = arith.mulf %258, %266 : vector<2x32xf32>
    %275 = arith.addf %273, %274 : vector<2x32xf32>
    %276 = math.tanh %275 : vector<2x32xf32>
    %277 = arith.mulf %272, %276 : vector<2x32xf32>
    %c4_98 = arith.constant 4 : index
    %c0_99 = arith.constant 0 : index
    %278 = vector.load %arg20[%c4_98, %c0_99] : memref<10x32xf32, #tpu.memory_space<vmem>>, vector<2x32xf32>
    tpu.vector_store %arg20[%c4_98, %c0_99], %277 {strides = array<i32>} : memref<10x32xf32, #tpu.memory_space<vmem>>, vector<2x32xf32>,
    %cst_100 = arith.constant dense<0.000000e+00> : vector<2x128xf32>
    %279 = tpu.matmul %247, %101, %cst_100 {dimension_numbers = #tpu.dot_dimension_numbers<[1], [0], [0], [1], [0, 0, 1, 1], [], []>} : vector<2x32xf32>, vector<32x128xf32>, vector<2x128xf32> -> vector<2x128xf32>
    %280 = arith.addf %95, %279 : vector<2x128xf32>
    %281 = vector.extract_strided_slice %280 {offsets = [0, 0], sizes = [2, 32], strides = [1, 1]} : vector<2x128xf32> to vector<2x32xf32>
    %282 = arith.negf %281 : vector<2x32xf32>
    %283 = math.exp %282 : vector<2x32xf32>
    %cst_101 = arith.constant 1.000000e+00 : f32
    %284 = vector.broadcast %cst_101 : f32 to vector<2x32xf32>
    %285 = arith.addf %284, %283 : vector<2x32xf32>
    %286 = arith.divf %284, %285 : vector<2x32xf32>
    %287 = vector.extract_strided_slice %280 {offsets = [0, 32], sizes = [2, 32], strides = [1, 1]} : vector<2x128xf32> to vector<2x32xf32>
    %288 = arith.negf %287 : vector<2x32xf32>
    %289 = math.exp %288 : vector<2x32xf32>
    %cst_102 = arith.constant 1.000000e+00 : f32
    %290 = vector.broadcast %cst_102 : f32 to vector<2x32xf32>
    %291 = arith.addf %290, %289 : vector<2x32xf32>
    %292 = arith.divf %290, %291 : vector<2x32xf32>
    %293 = vector.extract_strided_slice %280 {offsets = [0, 64], sizes = [2, 32], strides = [1, 1]} : vector<2x128xf32> to vector<2x32xf32>
    %294 = math.tanh %293 : vector<2x32xf32>
    %295 = vector.extract_strided_slice %280 {offsets = [0, 96], sizes = [2, 32], strides = [1, 1]} : vector<2x128xf32> to vector<2x32xf32>
    %296 = arith.negf %295 : vector<2x32xf32>
    %297 = math.exp %296 : vector<2x32xf32>
    %cst_103 = arith.constant 1.000000e+00 : f32
    %298 = vector.broadcast %cst_103 : f32 to vector<2x32xf32>
    %299 = arith.addf %298, %297 : vector<2x32xf32>
    %300 = arith.divf %298, %299 : vector<2x32xf32>
    %301 = arith.mulf %292, %245 : vector<2x32xf32>
    %302 = arith.mulf %286, %294 : vector<2x32xf32>
    %303 = arith.addf %301, %302 : vector<2x32xf32>
    %304 = math.tanh %303 : vector<2x32xf32>
    %305 = arith.mulf %300, %304 : vector<2x32xf32>
    %cst_104 = arith.constant dense<0.000000e+00> : vector<2x128xf32>
    %306 = tpu.matmul %305, %102, %cst_104 {dimension_numbers = #tpu.dot_dimension_numbers<[1], [0], [0], [1], [0, 0, 1, 1], [], []>} : vector<2x32xf32>, vector<32x128xf32>, vector<2x128xf32> -> vector<2x128xf32>
    %cst_105 = arith.constant dense<0.000000e+00> : vector<2x128xf32>
    %307 = tpu.matmul %277, %103, %cst_105 {dimension_numbers = #tpu.dot_dimension_numbers<[1], [0], [0], [1], [0, 0, 1, 1], [], []>} : vector<2x32xf32>, vector<32x128xf32>, vector<2x128xf32> -> vector<2x128xf32>
    %308 = arith.addf %306, %307 : vector<2x128xf32>
    %309 = vector.broadcast %104 : vector<1x128xf32> to vector<2x128xf32>
    %310 = arith.addf %308, %309 : vector<2x128xf32>
    %311 = vector.extract_strided_slice %310 {offsets = [0, 0], sizes = [2, 32], strides = [1, 1]} : vector<2x128xf32> to vector<2x32xf32>
    %312 = arith.negf %311 : vector<2x32xf32>
    %313 = math.exp %312 : vector<2x32xf32>
    %cst_106 = arith.constant 1.000000e+00 : f32
    %314 = vector.broadcast %cst_106 : f32 to vector<2x32xf32>
    %315 = arith.addf %314, %313 : vector<2x32xf32>
    %316 = arith.divf %314, %315 : vector<2x32xf32>
    %317 = vector.extract_strided_slice %310 {offsets = [0, 32], sizes = [2, 32], strides = [1, 1]} : vector<2x128xf32> to vector<2x32xf32>
    %318 = arith.negf %317 : vector<2x32xf32>
    %319 = math.exp %318 : vector<2x32xf32>
    %cst_107 = arith.constant 1.000000e+00 : f32
    %320 = vector.broadcast %cst_107 : f32 to vector<2x32xf32>
    %321 = arith.addf %320, %319 : vector<2x32xf32>
    %322 = arith.divf %320, %321 : vector<2x32xf32>
    %323 = vector.extract_strided_slice %310 {offsets = [0, 64], sizes = [2, 32], strides = [1, 1]} : vector<2x128xf32> to vector<2x32xf32>
    %324 = math.tanh %323 : vector<2x32xf32>
    %325 = vector.extract_strided_slice %310 {offsets = [0, 96], sizes = [2, 32], strides = [1, 1]} : vector<2x128xf32> to vector<2x32xf32>
    %326 = arith.negf %325 : vector<2x32xf32>
    %327 = math.exp %326 : vector<2x32xf32>
    %cst_108 = arith.constant 1.000000e+00 : f32
    %328 = vector.broadcast %cst_108 : f32 to vector<2x32xf32>
    %329 = arith.addf %328, %327 : vector<2x32xf32>
    %330 = arith.divf %328, %329 : vector<2x32xf32>
    %331 = arith.mulf %322, %275 : vector<2x32xf32>
    %332 = arith.mulf %316, %324 : vector<2x32xf32>
    %333 = arith.addf %331, %332 : vector<2x32xf32>
    %334 = math.tanh %333 : vector<2x32xf32>
    %335 = arith.mulf %330, %334 : vector<2x32xf32>
    %c6 = arith.constant 6 : index
    %c0_109 = arith.constant 0 : index
    %336 = vector.load %arg20[%c6, %c0_109] : memref<10x32xf32, #tpu.memory_space<vmem>>, vector<2x32xf32>
    tpu.vector_store %arg20[%c6, %c0_109], %335 {strides = array<i32>} : memref<10x32xf32, #tpu.memory_space<vmem>>, vector<2x32xf32>,
    %cst_110 = arith.constant dense<0.000000e+00> : vector<2x128xf32>
    %337 = tpu.matmul %305, %101, %cst_110 {dimension_numbers = #tpu.dot_dimension_numbers<[1], [0], [0], [1], [0, 0, 1, 1], [], []>} : vector<2x32xf32>, vector<32x128xf32>, vector<2x128xf32> -> vector<2x128xf32>
    %338 = arith.addf %100, %337 : vector<2x128xf32>
    %339 = vector.extract_strided_slice %338 {offsets = [0, 0], sizes = [2, 32], strides = [1, 1]} : vector<2x128xf32> to vector<2x32xf32>
    %340 = arith.negf %339 : vector<2x32xf32>
    %341 = math.exp %340 : vector<2x32xf32>
    %cst_111 = arith.constant 1.000000e+00 : f32
    %342 = vector.broadcast %cst_111 : f32 to vector<2x32xf32>
    %343 = arith.addf %342, %341 : vector<2x32xf32>
    %344 = arith.divf %342, %343 : vector<2x32xf32>
    %345 = vector.extract_strided_slice %338 {offsets = [0, 32], sizes = [2, 32], strides = [1, 1]} : vector<2x128xf32> to vector<2x32xf32>
    %346 = arith.negf %345 : vector<2x32xf32>
    %347 = math.exp %346 : vector<2x32xf32>
    %cst_112 = arith.constant 1.000000e+00 : f32
    %348 = vector.broadcast %cst_112 : f32 to vector<2x32xf32>
    %349 = arith.addf %348, %347 : vector<2x32xf32>
    %350 = arith.divf %348, %349 : vector<2x32xf32>
    %351 = vector.extract_strided_slice %338 {offsets = [0, 64], sizes = [2, 32], strides = [1, 1]} : vector<2x128xf32> to vector<2x32xf32>
    %352 = math.tanh %351 : vector<2x32xf32>
    %353 = vector.extract_strided_slice %338 {offsets = [0, 96], sizes = [2, 32], strides = [1, 1]} : vector<2x128xf32> to vector<2x32xf32>
    %354 = arith.negf %353 : vector<2x32xf32>
    %355 = math.exp %354 : vector<2x32xf32>
    %cst_113 = arith.constant 1.000000e+00 : f32
    %356 = vector.broadcast %cst_113 : f32 to vector<2x32xf32>
    %357 = arith.addf %356, %355 : vector<2x32xf32>
    %358 = arith.divf %356, %357 : vector<2x32xf32>
    %359 = arith.mulf %350, %303 : vector<2x32xf32>
    %360 = arith.mulf %344, %352 : vector<2x32xf32>
    %361 = arith.addf %359, %360 : vector<2x32xf32>
    %362 = math.tanh %361 : vector<2x32xf32>
    %363 = arith.mulf %358, %362 : vector<2x32xf32>
    %cst_114 = arith.constant dense<0.000000e+00> : vector<2x128xf32>
    %364 = tpu.matmul %363, %102, %cst_114 {dimension_numbers = #tpu.dot_dimension_numbers<[1], [0], [0], [1], [0, 0, 1, 1], [], []>} : vector<2x32xf32>, vector<32x128xf32>, vector<2x128xf32> -> vector<2x128xf32>
    %cst_115 = arith.constant dense<0.000000e+00> : vector<2x128xf32>
    %365 = tpu.matmul %335, %103, %cst_115 {dimension_numbers = #tpu.dot_dimension_numbers<[1], [0], [0], [1], [0, 0, 1, 1], [], []>} : vector<2x32xf32>, vector<32x128xf32>, vector<2x128xf32> -> vector<2x128xf32>
    %366 = arith.addf %364, %365 : vector<2x128xf32>
    %367 = vector.broadcast %104 : vector<1x128xf32> to vector<2x128xf32>
    %368 = arith.addf %366, %367 : vector<2x128xf32>
    %369 = vector.extract_strided_slice %368 {offsets = [0, 0], sizes = [2, 32], strides = [1, 1]} : vector<2x128xf32> to vector<2x32xf32>
    %370 = arith.negf %369 : vector<2x32xf32>
    %371 = math.exp %370 : vector<2x32xf32>
    %cst_116 = arith.constant 1.000000e+00 : f32
    %372 = vector.broadcast %cst_116 : f32 to vector<2x32xf32>
    %373 = arith.addf %372, %371 : vector<2x32xf32>
    %374 = arith.divf %372, %373 : vector<2x32xf32>
    %375 = vector.extract_strided_slice %368 {offsets = [0, 32], sizes = [2, 32], strides = [1, 1]} : vector<2x128xf32> to vector<2x32xf32>
    %376 = arith.negf %375 : vector<2x32xf32>
    %377 = math.exp %376 : vector<2x32xf32>
    %cst_117 = arith.constant 1.000000e+00 : f32
    %378 = vector.broadcast %cst_117 : f32 to vector<2x32xf32>
    %379 = arith.addf %378, %377 : vector<2x32xf32>
    %380 = arith.divf %378, %379 : vector<2x32xf32>
    %381 = vector.extract_strided_slice %368 {offsets = [0, 64], sizes = [2, 32], strides = [1, 1]} : vector<2x128xf32> to vector<2x32xf32>
    %382 = math.tanh %381 : vector<2x32xf32>
    %383 = vector.extract_strided_slice %368 {offsets = [0, 96], sizes = [2, 32], strides = [1, 1]} : vector<2x128xf32> to vector<2x32xf32>
    %384 = arith.negf %383 : vector<2x32xf32>
    %385 = math.exp %384 : vector<2x32xf32>
    %cst_118 = arith.constant 1.000000e+00 : f32
    %386 = vector.broadcast %cst_118 : f32 to vector<2x32xf32>
    %387 = arith.addf %386, %385 : vector<2x32xf32>
    %388 = arith.divf %386, %387 : vector<2x32xf32>
    %389 = arith.mulf %380, %333 : vector<2x32xf32>
    %390 = arith.mulf %374, %382 : vector<2x32xf32>
    %391 = arith.addf %389, %390 : vector<2x32xf32>
    %392 = math.tanh %391 : vector<2x32xf32>
    %393 = arith.mulf %388, %392 : vector<2x32xf32>
    %c8 = arith.constant 8 : index
    %c0_119 = arith.constant 0 : index
    %394 = vector.load %arg20[%c8, %c0_119] : memref<10x32xf32, #tpu.memory_space<vmem>>, vector<2x32xf32>
    tpu.vector_store %arg20[%c8, %c0_119], %393 {strides = array<i32>} : memref<10x32xf32, #tpu.memory_space<vmem>>, vector<2x32xf32>,
    %c0_120 = arith.constant 0 : index
    %c0_121 = arith.constant 0 : index
    %395 = vector.load %arg20[%c0_120, %c0_121] : memref<10x32xf32, #tpu.memory_space<vmem>>, vector<10x32xf32>
    %c0_122 = arith.constant 0 : index
    %c0_123 = arith.constant 0 : index
    %396 = vector.load %arg16[%c0_122, %c0_123] : memref<32x128xf32, #tpu.memory_space<vmem>>, vector<32x128xf32>
    %cst_124 = arith.constant dense<0.000000e+00> : vector<10x128xf32>
    %397 = tpu.matmul %395, %396, %cst_124 {dimension_numbers = #tpu.dot_dimension_numbers<[1], [0], [0], [1], [0, 0, 1, 1], [], []>} : vector<10x32xf32>, vector<32x128xf32>, vector<10x128xf32> -> vector<10x128xf32>
    %c0_125 = arith.constant 0 : index
    %c0_126 = arith.constant 0 : index
    %398 = vector.load %arg17[%c0_125, %c0_126] : memref<1x128xf32, #tpu.memory_space<vmem>>, vector<1x128xf32>
    %399 = vector.broadcast %398 : vector<1x128xf32> to vector<10x128xf32>
    %400 = arith.addf %397, %399 : vector<10x128xf32>
    %c0_127 = arith.constant 0 : index
    %c0_128 = arith.constant 0 : index
    %401 = vector.load %arg18[%c0_127, %c0_128] : memref<10x128xf32, #tpu.memory_space<vmem>>, vector<10x128xf32>
    tpu.vector_store %arg18[%c0_127, %c0_128], %400 {strides = array<i32>} : memref<10x128xf32, #tpu.memory_space<vmem>>, vector<10x128xf32>,
    %402 = tpu.iota {dimensions = array<i32: 1>} : vector<10x128xi32>
    %c0_129 = arith.constant 0 : index
    %c0_130 = arith.constant 0 : index
    %403 = vector.load %arg7[%c0_129, %c0_130] : memref<10x1xi32, #tpu.memory_space<vmem>>, vector<10x1xi32>
    %cst_131 = arith.constant dense<0xFF800000> : vector<10xf32>
    %404 = vector.multi_reduction <maximumf>, %400, %cst_131 [1] : vector<10x128xf32> to vector<10xf32>
    %405 = vector.shape_cast %404 : vector<10xf32> to vector<10x1xf32>
    %406 = vector.broadcast %405 : vector<10x1xf32> to vector<10x128xf32>
    %407 = arith.subf %400, %406 : vector<10x128xf32>
    %408 = math.exp %407 : vector<10x128xf32>
    %cst_132 = arith.constant dense<0.000000e+00> : vector<10xf32>
    %409 = vector.multi_reduction <add>, %408, %cst_132 [1] : vector<10x128xf32> to vector<10xf32>
    %410 = vector.shape_cast %409 : vector<10xf32> to vector<10x1xf32>
    %411 = math.log %410 : vector<10x1xf32>
    %412 = arith.addf %405, %411 : vector<10x1xf32>
    %413 = vector.broadcast %412 : vector<10x1xf32> to vector<10x128xf32>
    %414 = arith.subf %400, %413 : vector<10x128xf32>
    %415 = vector.broadcast %403 : vector<10x1xi32> to vector<10x128xi32>
    %416 = arith.cmpi eq, %402, %415 : vector<10x128xi32>
    %cst_133 = arith.constant 0.000000e+00 : f32
    %417 = vector.broadcast %cst_133 : f32 to vector<10x128xf32>
    %418 = arith.select %416, %414, %417 : vector<10x128xi1>, vector<10x128xf32>
    %cst_134 = arith.constant dense<0.000000e+00> : vector<10xf32>
    %419 = vector.multi_reduction <add>, %418, %cst_134 [1] : vector<10x128xf32> to vector<10xf32>
    %420 = vector.shape_cast %419 : vector<10xf32> to vector<10x1xf32>
    %c0_i32 = arith.constant 0 : i32
    %421 = vector.broadcast %c0_i32 : i32 to vector<10x1xi32>
    %422 = arith.cmpi ne, %403, %421 : vector<10x1xi32>
    %423 = arith.extui %422 : vector<10x1xi1> to vector<10x1xi32>
    %424 = arith.sitofp %423 : vector<10x1xi32> to vector<10x1xf32>
    %cst_135 = arith.constant 0.000000e+00 : f32
    %425 = vector.broadcast %cst_135 : f32 to vector<10x1xf32>
    %426 = arith.subf %425, %420 : vector<10x1xf32>
    %427 = arith.mulf %424, %426 : vector<10x1xf32>
    %cst_136 = arith.constant dense<0.000000e+00> : vector<1xf32>
    %428 = vector.multi_reduction <add>, %427, %cst_136 [0] : vector<10x1xf32> to vector<1xf32>
    %429 = vector.shape_cast %428 : vector<1xf32> to vector<1x1xf32>
    %cst_137 = arith.constant dense<0.000000e+00> : vector<1xf32>
    %430 = vector.multi_reduction <add>, %424, %cst_137 [0] : vector<10x1xf32> to vector<1xf32>
    %431 = vector.shape_cast %430 : vector<1xf32> to vector<1x1xf32>
    %cst_138 = arith.constant 1.000000e+00 : f32
    %432 = vector.broadcast %cst_138 : f32 to vector<1x1xf32>
    %433 = arith.maximumf %431, %432 : vector<1x1xf32>
    %434 = arith.divf %429, %433 : vector<1x1xf32>
    %c0_139 = arith.constant 0 : index
    %c0_140 = arith.constant 0 : index
    %435 = vector.load %arg19[%c0_139, %c0_140] : memref<1x1xf32, #tpu.memory_space<vmem>>, vector<1x1xf32>
    tpu.vector_store %arg19[%c0_139, %c0_140], %434 {strides = array<i32>} : memref<1x1xf32, #tpu.memory_space<vmem>>, vector<1x1xf32>,
    return
  }
}

</mosaic_0001>

<bundles_post_ra>
// kernel: tpu_custom_call.1
= control target key start
LH: loop header
LB: loop body
LE: loop exit
PB: predicated region body
PF: predicated region fallthrough
CT: control target
= control target key end

     0   :  { %s2386_s0 = inlined_call_operand.vmem [shape: f32[4,2,8,48], index: 0, kind: input, shape index: {}]   ;;  %s2387_s1 = inlined_call_operand.vmem [shape: f32[4], index: 1, kind: input, shape index: {}]   ;;  %s2388_s2 = inlined_call_operand.<no memory space> [shape: f32[1], index: 2, kind: input, shape index: {}]   ;;  %s2389_s3 = inlined_call_operand.vmem [shape: f32[1,48], index: 3, kind: input, shape index: {}]   ;;  %s2390_s4 = inlined_call_operand.<no memory space> [shape: f32[1], index: 4, kind: input, shape index: {}]   ;;  %s2391_s5 = inlined_call_operand.vmem [shape: s32[2,2], index: 5, kind: input, shape index: {}]   ;;  %s2392_s6 = inlined_call_operand.hbm [shape: f32[5,2,32], index: 6, kind: input, shape index: {}]   ;;  %s2393_s7 = inlined_call_operand.vmem [shape: s32[10,1], index: 7, kind: input, shape index: {}]   ;;  %s2394_s8 = inlined_call_operand.vmem [shape: f32[48,32], index: 8, kind: input, shape index: {}]   ;;  %s2395_s9 = inlined_call_operand.vmem [shape: f32[1,32], index: 9, kind: input, shape index: {}]   ;;  %s2396_s10 = inlined_call_operand.vmem [shape: f32[32,128], index: 10, kind: input, shape index: {}]   ;;  %s2397_s11 = inlined_call_operand.vmem [shape: f32[1,128], index: 11, kind: input, shape index: {}]   ;;  %s2398_s12 = inlined_call_operand.hbm [shape: f32[32,128], index: 12, kind: input, shape index: {}]   ;;  %s2399_s13 = inlined_call_operand.hbm [shape: f32[32,128], index: 13, kind: input, shape index: {}]   ;;  %s2400_s14 = inlined_call_operand.hbm [shape: f32[32,128], index: 14, kind: input, shape index: {}]   ;;  %s2401_s15 = inlined_call_operand.vmem [shape: f32[1,128], index: 15, kind: input, shape index: {}]   ;;  %s2402_s16 = inlined_call_operand.hbm [shape: f32[32,128], index: 16, kind: input, shape index: {}]   ;;  %s2403_s17 = inlined_call_operand.vmem [shape: f32[1,128], index: 17, kind: input, shape index: {}]   ;;  %s2404_s18 = inlined_call_operand.hbm [shape: f32[10,128], index: 18, kind: output, shape index: {0}]   ;;  %s2405_s19 = inlined_call_operand.hbm [shape: f32[1,1], index: 19, kind: output, shape index: {1}]  }
   0x1   :  { %2407 = sst [smem:[#allocation25_spill]] %s2386_s0 }
   0x2   :  { %2408 = sst [smem:[#allocation26_spill]] %s2387_s1 }
   0x3   :  { %2409 = sst [smem:[#allocation27_spill]] %s2388_s2 }
   0x4   :  { %2410 = sst [smem:[#allocation28_spill]] %s2389_s3 }
   0x5   :  { %27 = vsyncpa [#allocation8], 0 }
   0x6   :  { %28 = vsyncpa [#allocation6], 0 }
   0x7   :  { %29 = vsyncpa [#allocation11], 0 }
   0x8   :  { %30 = vsyncpa [#allocation14], 0 }
   0x9   :  { %31 = vsyncpa [#allocation7], 0  ;;  %s79_s20 = sshll.u32 %s2398_s12, 4  ;;  %s80_s20 = int_to_ptr.hbm [resolvable:$true] %s79_s20 }
   0xa   :  { %32 = vsyncpa [#allocation18], 0  ;;  %s1871_s21 = smov [#allocation10]   ;;  %s105_s23 = sshll.u32 %s2400_s14, 4  ;;  %s106_s23 = int_to_ptr.hbm [resolvable:$true] %s105_s23 }
   0xb   :  { %s81_s1 = sshll.u32 %s1871_s21, 4  ;;  %s1872_s24 = smov 128   ;;  %s82_s1 = int_to_ptr.vmem [resolvable:$true] %s81_s1 }
   0xc   :  { %s1873_s25 = smov 8   ;;  %s1874_s3 = smov [#allocation13]  }
   0xd   :  { %87 = dma.hbm_to_vmem [thread:$0]  %s80_s20, 512, %s82_s1, [#allocation11], %s1872_s24, %s1872_s24, %s1873_s25  }
   0xe   :  { %s107_s26 = sshll.u32 %s1874_s3, 4  ;;  %s2411_s28 = sld [smem:[#allocation26_spill]]  ;;  %s108_s26 = int_to_ptr.vmem [resolvable:$true] %s107_s26 }
   0xf   :  { %113 = dma.hbm_to_vmem [thread:$0]  %s106_s23, 512, %s108_s26, [#allocation14], %s1872_s24, %s1872_s24, %s1873_s25  }
  0x10   :  { %s56_s30 = sshll.u32 %s2392_s6, 4  ;;  %s1875_s21 = smov [#allocation5]   ;;  %s57_s30 = int_to_ptr.hbm [resolvable:$true] %s56_s30 }
  0x11   :  { %s1876_s20 = smov [#allocation9]   ;;  %s1877_s22 = smov 32  }
  0x12   :  { %s58_s1 = sshll.u32 %s1876_s20, 4  ;;  %s1878_s2 = smov 2   ;;  %s59_s1 = int_to_ptr.vmem [resolvable:$true] %s58_s1 }
  0x13   :  { %64 = dma.hbm_to_vmem [thread:$0]  %s57_s30, 160, %s59_s1, [#allocation6], %s1877_s22, %s1877_s22, %s1878_s2  }
  0x14   :  { %s40_s29 = sshll.u32 %s2411_s28, 4  ;;  %s92_s12 = sshll.u32 %s2399_s13, 4  ;;  %s41_s29 = int_to_ptr.vmem [resolvable:$true] %s40_s29  ;;  %s93_s12 = int_to_ptr.hbm [resolvable:$true] %s92_s12 }
  0x15   :  { %43 = dma.vmem_to_smem %s41_s29, 16, %s1875_s21, [#allocation8]  }
  0x16   :  { %s1879_s23 = smov [#allocation12]   ;;  %s120_s29 = sshll.u32 %s2402_s16, 4  ;;  %s121_s29 = int_to_ptr.hbm [resolvable:$true] %s120_s29 }
  0x17   :  { %s94_s26 = sshll.u32 %s1879_s23, 4  ;;  %s1880_s14 = smov [#allocation15]   ;;  %s95_s26 = int_to_ptr.vmem [resolvable:$true] %s94_s26 }
  0x18   :  { %100 = dma.hbm_to_vmem [thread:$0]  %s93_s12, 512, %s95_s26, [#allocation11], %s1872_s24, %s1872_s24, %s1873_s25  }
  0x19   :  { %s122_s0 = sshll.u32 %s1880_s14, 4  ;;  %s123_s0 = int_to_ptr.vmem [resolvable:$true] %s122_s0 }
  0x1a   :  { %128 = dma.hbm_to_vmem [thread:$0]  %s121_s29, 512, %s123_s0, [#allocation14], %s1872_s24, %s1872_s24, %s1873_s25  }
  0x1b   :  { %1859 = dma.done.wait [#allocation8], 16  }
  0x1c   :  { %1860 = vsyncadd [#allocation8], 4294967280 }
  0x1d   :  { %1861 = dma.done.wait [#allocation6], 160  }
  0x1e   :  { %1862 = vsyncadd [#allocation6], 4294967136 }
  0x1f   :  { %1863 = dma.done.wait [#allocation11], 1024  }
  0x20   :  { %1864 = vsyncadd [#allocation11], 4294966272 }
  0x21   :  { %1865 = dma.done.wait [#allocation14], 1024  }
  0x22   :  { %1866 = vsyncadd [#allocation14], 4294966272 }
  0x23   :  { %155 = sfence }
  0x24   :  { %v214_v0 = vld [vmem:[%s2391_s5] sm:$0x3]  ;;  %s156_s30 = sld [smem:[#allocation5]]  ;;  %v1881_v1 = vmov 0   ;;  %v1882_v20 = vmov 1   ;;  %vm201_vm0 = vcmask 392192   ;;  %v212_v37 = vlaneseq }
  0x25   :  { %1561 = vset.pattern.permute.xlu0 %v1881_v1  ;;  %s1500_s21 = sld [smem:[#allocation5 + $0x1]]  ;;  %1570 = vset.pattern.permute.xlu1 %v1881_v1  ;;  %v1883_v42 = vmov 0.0   ;;  %v209_v49 = vstv %s2390_s4  ;;  %vm255_vm4 = vcmask 1041409   ;;  %vm258_vm5 = vcmask 58368   ;;  %s1468_s1 = sshll.u32 %s2404_s18, 4  ;;  %s1469_s1 = int_to_ptr.hbm [resolvable:$true] %s1468_s1 }
  0x26   :  { %216 = vperm.xlu0 %1561, %v214_v0   ;;  %s1503_s20 = sld [smem:[#allocation5 + $0x2]]  ;;  %v229_v38 = vshrl.u32 %v212_v37, 7  ;;  %v2060_v40 = vand.u32 127, %v212_v37  ;;  %s1885_s2 = smov [#allocation16]  }
  0x27   :  { %s2412_s3 = sld [smem:[#allocation25_spill]]  ;;  %s1466_s27 = sshll.u32 %s1885_s2, 4  ;;  %s1467_s27 = int_to_ptr.vmem [resolvable:$true] %s1466_s27 }
  0x28   :  { %s1506_s23 = sld [smem:[#allocation5 + $0x3]]  ;;  %1563 = vset.pattern.permute.xlu2 %v229_v38  ;;  %s1886_s18 = smov [#allocation17]  }
  0x29   :  { %s2413_s12 = sld [smem:[#allocation27_spill]] }
  0x2a   :  { %v159_v6 = vstv %s156_s30  ;;  %s2414_s26 = sld [smem:[#allocation28_spill]] }
  0x2b   :  { %v168_v10 = vstv %s1500_s21  ;;  %s1482_s21 = sshll.u32 %s2405_s19, 4  ;;  %s1483_s21 = int_to_ptr.hbm [resolvable:$true] %s1482_s21 }
  0x2c   :  { %v177_v15 = vstv %s1503_s20 }
  0x2d   :  { %v157_v2 = vld [vmem:[%s2412_s3] sm:$0xff]  ;;  %v1501_v3 = vld [vmem:[%s2412_s3 + $0x10] sm:$0xff]  ;;  %v158_v4 = vld [vmem:[%s2412_s3 + $0x8] sm:$0xff] }
  0x2e   :  { %v1502_v5 = vld [vmem:[%s2412_s3 + $0x18] sm:$0xff]  ;;  %v1504_v7 = vld [vmem:[%s2412_s3 + $0x20] sm:$0xff]  ;;  %v1505_v8 = vld [vmem:[%s2412_s3 + $0x28] sm:$0xff]  ;;  %v160_v9 = vmul.f32 %v159_v6, %v157_v2  ;;  %v161_v12 = vmul.f32 %v159_v6, %v158_v4  ;;  %v169_v14 = vmul.f32 %v1501_v3, %v168_v10  ;;  %v186_v18 = vstv %s1506_s23  ;;  %1562 = vset.pattern.permute.xlu0 %v1882_v20 }
  0x2f   :  { %v1507_v11 = vld [vmem:[%s2412_s3 + $0x30] sm:$0xff]  ;;  %v1508_v13 = vld [vmem:[%s2412_s3 + $0x38] sm:$0xff]  ;;  %v170_v16 = vmul.f32 %v1502_v5, %v168_v10  ;;  %v178_v17 = vmul.f32 %v1504_v7, %v177_v15  ;;  %v179_v19 = vmul.f32 %v1505_v8, %v177_v15  ;;  %220 = vperm.xlu0 %1562, %v214_v0   ;;  %v192_v27 = vstv %s2413_s12 }
  0x30   :  { %v171_v21 = vadd.f32 %v169_v14, %v160_v9  ;;  %v187_v22 = vmul.f32 %v1507_v11, %v186_v18  ;;  %v188_v24 = vmul.f32 %v1508_v13, %v186_v18  ;;  %v1572_v29 = vld [vmem:[%s2414_s26] ss:$0 sm:$0xff] }
  0x31   :  { %v172_v23 = vadd.f32 %v170_v16, %v161_v12 }
  0x32   :  { %v180_v25 = vadd.f32 %v178_v17, %v171_v21 }
  0x33   :  { %v181_v26 = vadd.f32 %v179_v19, %v172_v23 }
  0x34   :  { %v189_v28 = vadd.f32 %v187_v22, %v180_v25 }
  0x35   :  { %v190_v30 = vadd.f32 %v188_v24, %v181_v26 }
  0x36   :  { %v2052_v31 = vmul.f32 %v192_v27, %v189_v28 }
  0x37   :  { %v2055_v33 = vmul.f32 %v192_v27, %v190_v30  ;;  %1571 = vset.pattern.permute.xlu0 %v1881_v1 }
  0x38   :  { %v199_v32 = vmul.f32 %v1572_v29, %v2052_v31 }
  0x39   :  { %v200_v35 = vmul.f32 %v1572_v29, %v2055_v33 }
  0x3a   :  { %v202_v34 = vsel %vm201_vm0, %v199_v32, 0.0 }
  0x3b   :  { %203 = vadd.xlane.f32.xlu1 %v202_v34  ;;  %v205_v36 = vsel %vm201_vm0, %v200_v35, 0.0 }
  0x43   :  { %206 = vadd.xlane.f32.xlu1 %v205_v36 }
  0x98   :  { %v217_v39 = vpop.permute.xlu0 %216 }
  0x99   :  { %vm218_vm1 = vcmp.ge.s32.totalorder %v2060_v40, %v217_v39 }
  0xa1   :  { %v221_v41 = vpop.permute.xlu0 %220 }
  0xa2   :  { %vm222_vm2 = vcmp.le.s32.totalorder %v2060_v40, %v221_v41 }
  0xa3   :  { %vm223_vm3 = vmand %vm218_vm1, %vm222_vm2 }
  0xa4   :  { %v1509_v43 = vsel %vm223_vm3, 1.0, %v1883_v42 }
  0xa5   :  { %v227_v44 = vperm.slane %v1509_v43, 0  ;;  %v234_v45 = vperm.slane %v1509_v43, 1 }
  0xa7   :  { %v1564_v46 = vpack.i.bf16 %v234_v45, %v227_v44 }
  0xa9   :  { %1565 = vperm.xlu2 %1563, %v1564_v46  }
  0xae   :  { %v204_v47 = vpop.xlane.xlu1 %203 }
  0xaf   :  { %v210_v52 = vadd.f32 %v209_v49, %v204_v47 }
  0xb1   :  { %1569 = vset.pattern.permute.xlu2 %v1881_v1 }
  0xb6   :  { %v207_v48 = vpop.xlane.xlu1 %206 }
  0xb7   :  { %v211_v50 = vadd.f32 %v209_v49, %v207_v48 }
 0x103   :  { %v2068_v51 = vpop.permute.xlu2 %1565 }
 0x104   :  { %v1568_v53 = vunpack.i.h.bf16 %v2068_v51  ;;  %v1567_v54 = vunpack.i.l.bf16 %v2068_v51 }
 0x106   :  { %v243_v55 = vmul.f32 %v1567_v54, %v210_v52  ;;  %v244_v56 = vmul.f32 %v1568_v53, %v211_v50 }
 0x108   :  { %248 = vperm.xlu2 %1569, %v243_v55   ;;  %251 = vperm.xlu1 %1570, %v244_v56  }
 0x162   :  { %v249_v57 = vpop.permute.xlu2 %248 }
 0x163   :  { %v253_v59 = vperm.slane %v249_v57, %v2060_v40 }
 0x17a   :  { %v252_v58 = vpop.permute.xlu1 %251 }
 0x17b   :  { %v254_v60 = vperm.slane %v252_v58, %v2060_v40 }
 0x17d   :  { %v256_v61 = vsel %vm255_vm4, %v254_v60, %v253_v59 }
 0x17e   :  { %v259_v62 = vsel %vm258_vm5, %v256_v61, -inf }
 0x17f   :  { %260 = vmax.xlane.f32.xlu2 %v259_v62 }
 0x1f2   :  { %v261_v63 = vpop.xlane.xlu2 %260 }
 0x1f3   :  { %v263_v0 = vperm.slane %v261_v63, 0  ;;  %v264_v1 = vperm.slane %v261_v63, 1 }
 0x1f5   :  { %v267_v2 = vsub.f32 %v243_v55, %v263_v0  ;;  %v268_v4 = vsub.f32 %v244_v56, %v264_v1 }
 0x1f7   :  { %v269_v3 = vmul.f32 1.442695, %v267_v2  ;;  %v271_v5 = vmul.f32 1.442695, %v268_v4 }
 0x1f9   :  { %1577 = vpow2.f32 %v269_v3 }
 0x1fa   :  { %1579 = vpow2.f32 %v271_v5 }
 0x1ff   :  { %v1578_v6 = vpop.eup %1577 }
 0x200   :  { %276 = vperm.xlu0 %1571, %v1578_v6   ;;  %v1580_v7 = vpop.eup %1579 }
 0x208   :  { %279 = vperm.xlu0 %1571, %v1580_v7  }
 0x272   :  { %v277_v8 = vpop.permute.xlu0 %276 }
 0x273   :  { %v281_v10 = vperm.slane %v277_v8, %v2060_v40 }
 0x27a   :  { %v280_v9 = vpop.permute.xlu0 %279 }
 0x27b   :  { %v282_v11 = vperm.slane %v280_v9, %v2060_v40 }
 0x27d   :  { %v283_v12 = vsel %vm255_vm4, %v282_v11, %v281_v10 }
 0x27e   :  { %v285_v13 = vsel %vm258_vm5, %v283_v12, 0.0 }
 0x27f   :  { %286 = vadd.xlane.f32.xlu1 %v285_v13  ;;  %v407_v13 = vld [vmem:[%s2394_s8 + $0x28] sm:$0xff] }
 0x280   :  { %427 = vmatpush.msra.mxu0 %v407_v13 }
 0x2f2   :  { %v287_v14 = vpop.xlane.xlu1 %286 }
 0x2f3   :  { %v289_v15 = vperm.slane %v287_v14, 0  ;;  %v290_v16 = vperm.slane %v287_v14, 1  ;;  %v406_v14 = vld [vmem:[%s2394_s8 + $0x20] sm:$0xff] }
 0x2f4   :  { %428 = vmatpush.msra.mxu0 %v406_v14 }
 0x2f5   :  { %1581 = vrcp.f32 %v289_v15  ;;  %v304_v23 = vand.u32 2147483648, %v289_v15  ;;  %v302_v25 = vand.u32 2147483647, %v289_v15  ;;  %vm298_vm7 = vweird.f32 %v289_v15 }
 0x2f6   :  { %1583 = vrcp.f32 %v290_v16  ;;  %v319_v30 = vand.u32 2147483648, %v290_v16  ;;  %vm313_vm11 = vweird.f32 %v290_v16  ;;  %v317_v34 = vand.u32 2147483647, %v290_v16 }
 0x2f7   :  { %v305_v28 = vor.u32 1.1754944e-38, %v304_v23  ;;  %vm303_vm10 = vcmp.eq.f32.partialorder %v302_v25, 8.507059e+37  ;;  %v438_v23 = vld [vmem:[%s2396_s10 + $0x8] sm:$0xff] }
 0x2f8   :  { %v320_v38 = vor.u32 1.1754944e-38, %v319_v30  ;;  %vm318_vm13 = vcmp.eq.f32.partialorder %v317_v34, 8.507059e+37  ;;  %v2123_v25 = vld [vmem:[#allocation13 + $0x10] sm:$0xff] }
 0x2f9   :  { %v2134_v34 = vld [vmem:[#allocation10 + $0x10] sm:$0xff] }
 0x2fb   :  { %v1582_v17 = vpop.eup %1581 }
 0x2fc   :  { %v1584_v18 = vpop.eup %1583  ;;  %v294_v19 = vmul.f32 %v1582_v17, %v289_v15  ;;  %vm299_vm6 = vweird.f32 %v1582_v17  ;;  %v405_v15 = vld [vmem:[%s2394_s8 + $0x18] sm:$0xff] }
 0x2fd   :  { %v309_v20 = vmul.f32 %v1584_v18, %v290_v16  ;;  %vm314_vm8 = vweird.f32 %v1584_v18  ;;  %vm300_vm9 = vmor %vm298_vm7, %vm299_vm6  ;;  %429 = vmatpush.msra.mxu0 %v405_v15  ;;  %v404_v16 = vld [vmem:[%s2394_s8 + $0x10] sm:$0xff] }
 0x2fe   :  { %v295_v21 = vsub.f32 1.0, %v294_v19  ;;  %vm315_vm12 = vmor %vm313_vm11, %vm314_vm8  ;;  %vm446_vm8 = vcmask 261120  }
 0x2ff   :  { %v310_v22 = vsub.f32 1.0, %v309_v20  ;;  %430 = vmatpush.msra.mxu0 %v404_v16  ;;  %v440_v20 = vld [vmem:[%s2396_s10 + $0x18] sm:$0xff] }
 0x300   :  { %v296_v24 = vmul.f32 %v1582_v17, %v295_v21  ;;  %v439_v21 = vld [vmem:[%s2396_s10 + $0x10] sm:$0xff]  ;;  %487 = vmatpush.msra.mxu3 %v440_v20  ;;  %462 = vmatpush.msra.mxu1 %v440_v20 }
 0x301   :  { %v311_v26 = vmul.f32 %v1584_v18, %v310_v22  ;;  %562 = vmatpush.msra.mxu2 %v440_v20 }
 0x302   :  { %v297_v27 = vadd.f32 %v1582_v17, %v296_v24  ;;  %v2120_v24 = vld [vmem:[#allocation13 + $0x18] sm:$0xff]  ;;  %488 = vmatpush.msra.mxu3 %v439_v21  ;;  %463 = vmatpush.msra.mxu1 %v439_v21 }
 0x303   :  { %v312_v29 = vadd.f32 %v1584_v18, %v311_v26  ;;  %v437_v26 = vld [vmem:[%s2396_s10] sm:$0xff]  ;;  %563 = vmatpush.msra.mxu2 %v439_v21 }
 0x304   :  { %v301_v32 = vsel %vm300_vm9, %v1582_v17, %v297_v27  ;;  %v403_v17 = vld [vmem:[%s2394_s8 + $0x8] sm:$0xff]  ;;  %489 = vmatpush.msra.mxu3 %v438_v23  ;;  %464 = vmatpush.msra.mxu1 %v438_v23 }
 0x305   :  { %v306_v35 = vsel %vm303_vm10, %v305_v28, %v301_v32  ;;  %v316_v37 = vsel %vm315_vm12, %v1584_v18, %v312_v29  ;;  %v402_v18 = vld [vmem:[%s2394_s8] sm:$0xff]  ;;  %431 = vmatpush.msra.mxu0 %v403_v17  ;;  %564 = vmatpush.msra.mxu2 %v438_v23  ;;  %v2131_v29 = vld [vmem:[#allocation10 + $0x18] sm:$0xff] }
 0x306   :  { %v307_v36 = vmul.f32 %v1578_v6, %v306_v35  ;;  %v321_v41 = vsel %vm318_vm13, %v320_v38, %v316_v37  ;;  %490 = vmatpush.msra.mxu3 %v437_v26  ;;  %465 = vmatpush.msra.mxu1 %v437_v26  ;;  %v496_v32 = vld [vmem:[#allocation9 + $0x4] sm:$0x3] }
 0x307   :  { %v322_v43 = vmul.f32 %v1580_v7, %v321_v41  ;;  %432 = vmatpush.msra.mxu0 %v402_v18  ;;  %565 = vmatpush.msra.mxu2 %v437_v26 }
 0x308   :  { %v323_v39 = vmul.f32 %v1567_v54, %v307_v36  ;;  %512 = vmatpush.msrb.mxu3 %v440_v20  ;;  %537 = vmatpush.msrb.mxu1 %v440_v20  ;;  %v2137_v36 = vld [vmem:[#allocation10 + $0x8] sm:$0xff] }
 0x309   :  { %v324_v44 = vmul.f32 %v1568_v53, %v322_v43  ;;  %659 = vmatpush.msrb.mxu0 %v2120_v24  ;;  %751 = vmatpush.msrb.mxu2 %v2131_v29 }
 0x30a   :  { %328 = vperm.xlu0 %1571, %v323_v39   ;;  %513 = vmatpush.msrb.mxu3 %v439_v21 }
 0x30b   :  { %660 = vmatpush.msrb.mxu0 %v2123_v25  ;;  %538 = vmatpush.msrb.mxu1 %v439_v21 }
 0x30c   :  { %514 = vmatpush.msrb.mxu3 %v438_v23  ;;  %752 = vmatpush.msrb.mxu2 %v2134_v34 }
 0x30d   :  { %539 = vmatpush.msrb.mxu1 %v438_v23  ;;  %v546_v23 = vld [vmem:[#allocation9 + $0x8] sm:$0x3] }
 0x30e   :  { %515 = vmatpush.msrb.mxu3 %v437_v26  ;;  %753 = vmatpush.msrb.mxu2 %v2137_v36 }
 0x30f   :  { %540 = vmatpush.msrb.mxu1 %v437_v26  ;;  %v2188_v26 = vld [vmem:[#allocation12 + $0x18] sm:$0xff]  ;;  %1515 = vmatmul.msk.f32.vlgmr.msra.gmra.mxu2 %vm446_vm8, %v546_v23 }
 0x312   :  { %331 = vperm.xlu0 %1571, %v324_v44  }
 0x37c   :  { %v329_v45 = vpop.permute.xlu0 %328 }
 0x37d   :  { %v333_v47 = vperm.slane %v329_v45, %v2060_v40 }
 0x384   :  { %v332_v46 = vpop.permute.xlu0 %331 }
 0x385   :  { %v334_v48 = vperm.slane %v332_v46, %v2060_v40 }
 0x387   :  { %v335_v49 = vsel %vm255_vm4, %v334_v48, %v333_v47 }
 0x388   :  { %v337_v50 = vsel %vm258_vm5, %v335_v49, 0.0 }
 0x389   :  { %338 = vadd.xlane.f32.xlu2 %v337_v50 }
 0x3fc   :  { %v339_v52 = vpop.xlane.xlu2 %338 }
 0x3fd   :  { %v340_v54 = vadd.f32 1e-13, %v339_v52  ;;  %v2148_v52 = vld [vmem:[#allocation13 + $0x8] sm:$0xff] }
 0x3fe   :  { %661 = vmatpush.msrb.mxu0 %v2148_v52 }
 0x3ff   :  { %v342_v55 = vperm.slane %v340_v54, 0  ;;  %v343_v56 = vperm.slane %v340_v54, 1  ;;  %v2151_v54 = vld [vmem:[#allocation10] sm:$0xff] }
 0x400   :  { %754 = vmatpush.msrb.mxu2 %v2151_v54 }
 0x401   :  { %1585 = vrcp.f32 %v342_v55  ;;  %v357_v61 = vand.u32 2147483648, %v342_v55  ;;  %v372_v62 = vand.u32 2147483648, %v343_v56  ;;  %v355_v0 = vand.u32 2147483647, %v342_v55 }
 0x402   :  { %1587 = vrcp.f32 %v343_v56  ;;  %v370_v2 = vand.u32 2147483647, %v343_v56  ;;  %vm351_vm1 = vweird.f32 %v342_v55  ;;  %vm366_vm2 = vweird.f32 %v343_v56  ;;  %959 = vmatpush.msra.mxu2 %v2120_v24 }
 0x403   :  { %v358_v5 = vor.u32 1.1754944e-38, %v357_v61  ;;  %v373_v6 = vor.u32 1.1754944e-38, %v372_v62  ;;  %vm356_vm6 = vcmp.eq.f32.partialorder %v355_v0, 8.507059e+37  ;;  %v2175_v61 = vld [vmem:[%s2397_s11] ss:$0 sm:$0xff] }
 0x404   :  { %vm371_vm7 = vcmp.eq.f32.partialorder %v370_v2, 8.507059e+37  ;;  %960 = vmatpush.msra.mxu2 %v2123_v25 }
 0x406   :  { %961 = vmatpush.msra.mxu2 %v2148_v52 }
 0x407   :  { %v1586_v51 = vpop.eup %1585 }
 0x408   :  { %v1588_v53 = vpop.eup %1587  ;;  %v347_v57 = vmul.f32 %v1586_v51, %v342_v55  ;;  %vm352_vm14 = vweird.f32 %v1586_v51  ;;  %v2153_v55 = vld [vmem:[#allocation13] sm:$0xff] }
 0x409   :  { %v362_v58 = vmul.f32 %v1588_v53, %v343_v56  ;;  %vm367_vm15 = vweird.f32 %v1588_v53  ;;  %vm353_vm3 = vmor %vm351_vm1, %vm352_vm14  ;;  %662 = vmatpush.msrb.mxu0 %v2153_v55  ;;  %v442_v56 = vld [vmem:[#allocation9] sm:$0x3]  ;;  %962 = vmatpush.msra.mxu2 %v2153_v55 }
 0x40a   :  { %v348_v59 = vsub.f32 1.0, %v347_v57  ;;  %vm368_vm5 = vmor %vm366_vm2, %vm367_vm15  ;;  %1511 = vmatmul.msk.f32.vlgmr.msra.gmra.mxu1 %vm446_vm8, %v442_v56 }
 0x40b   :  { %v363_v60 = vsub.f32 1.0, %v362_v58  ;;  %684 = vmatpush.msra.mxu1 %v2188_v26 }
 0x40c   :  { %v349_v63 = vmul.f32 %v1586_v51, %v348_v59 }
 0x40d   :  { %v364_v1 = vmul.f32 %v1588_v53, %v363_v60 }
 0x40e   :  { %v350_v3 = vadd.f32 %v1586_v51, %v349_v63 }
 0x40f   :  { %v365_v4 = vadd.f32 %v1588_v53, %v364_v1 }
 0x410   :  { %v354_v7 = vsel %vm353_vm3, %v1586_v51, %v350_v3  ;;  %v1573_v51 = vld [vmem:[%s2395_s9] ss:$0 sm:$0xff]  ;;  %s1884_s9 = smov 64  }
 0x411   :  { %v369_v8 = vsel %vm368_vm5, %v1588_v53, %v365_v4  ;;  %v359_v9 = vsel %vm356_vm6, %v358_v5, %v354_v7  ;;  %vm737_vm5 = vcmask 254976  }
 0x412   :  { %v374_v10 = vsel %vm371_vm7, %v373_v6, %v369_v8  ;;  %v360_v11 = vmul.f32 %v359_v9, %v323_v39 }
 0x413   :  { %v375_v12 = vmul.f32 %v374_v10, %v324_v44 }
 0x414   :  { %378 = vperm.xlu0 %1571, %v360_v11  }
 0x415   :  { %383 = vperm.xlu2 %1569, %v375_v12  }
 0x46f   :  { %v384_v19 = vpop.permute.xlu2 %383 }
 0x470   :  { %v387_v22 = vmul.f32 %v384_v19, %v2055_v33  ;;  %v471_v33 = vld [vmem:[#allocation9 + $0x2] sm:$0x3] }
 0x471   :  { %1512 = vmatmul.msk.f32.vlgmr.msra.gmra.mxu3 %vm446_vm8, %v471_v33  ;;  %v2192_v33 = vld [vmem:[#allocation12 + $0x10] sm:$0xff] }
 0x472   :  { %v395_v27 = vsel %vm201_vm0, %v387_v22, 0.0  ;;  %598 = vmatpush.msra.mxu3 %v2131_v29  ;;  %v521_v22 = vld [vmem:[#allocation9 + $0x6] sm:$0x3]  ;;  %685 = vmatpush.msra.mxu1 %v2192_v33 }
 0x473   :  { %v396_v28 = vrot.slane %v395_v27, 4  ;;  %1514 = vmatmul.msk.f32.vlgmr.msrb.gmra.mxu1 %vm446_vm8, %v521_v22 }
 0x474   :  { %599 = vmatpush.msra.mxu3 %v2134_v34 }
 0x475   :  { %v397_v30 = vadd.f32 %v396_v28, %v395_v27  ;;  %v2196_v27 = vld [vmem:[#allocation12 + $0x8] sm:$0xff]  ;;  %v2202_v28 = vld [vmem:[#allocation12] sm:$0xff] }
 0x476   :  { %600 = vmatpush.msra.mxu3 %v2137_v36  ;;  %686 = vmatpush.msra.mxu1 %v2196_v27 }
 0x477   :  { %v398_v38 = vrot.slane %v397_v30, 2 }
 0x478   :  { %601 = vmatpush.msra.mxu3 %v2151_v54  ;;  %687 = vmatpush.msra.mxu1 %v2202_v28 }
 0x479   :  { %1513 = vmatmul.msk.f32.vlgmr.msrb.gmra.mxu3 %vm446_vm8, %v496_v32  ;;  %v399_v43 = vadd.f32 %v398_v38, %v397_v30  ;;  %v2235_v38 = vpop.f32.mrf.mxu2 }
 0x47a   :  { %811 = vmatpush.msrb.mxu3 %v2120_v24  ;;  %899 = vmatpush.msrb.mxu1 %v2131_v29 }
 0x47b   :  { %v400_v46 = vrot.slane %v399_v43, 1 }
 0x47c   :  { %812 = vmatpush.msrb.mxu3 %v2123_v25  ;;  %900 = vmatpush.msrb.mxu1 %v2134_v34 }
 0x47d   :  { %v401_v49 = vadd.f32 %v400_v46, %v399_v43 }
 0x47e   :  { %813 = vmatpush.msrb.mxu3 %v2148_v52  ;;  %901 = vmatpush.msrb.mxu1 %v2137_v36 }
 0x480   :  { %814 = vmatpush.msrb.mxu3 %v2153_v55  ;;  %902 = vmatpush.msrb.mxu1 %v2151_v54 }
 0x486   :  { %v379_v35 = vpop.permute.xlu0 %378 }
 0x487   :  { %v386_v37 = vmul.f32 %v379_v35, %v2052_v31  ;;  %v467_v60 = vpop.f32.mrf.mxu1 }
 0x488   :  { %v468_v62 = vadd.f32 %v2175_v61, %v467_v60 }
 0x489   :  { %v388_v39 = vsel %vm201_vm0, %v386_v37, 0.0 }
 0x48a   :  { %v389_v41 = vrot.slane %v388_v39, 4 }
 0x48c   :  { %v390_v44 = vadd.f32 %v389_v41, %v388_v39  ;;  %v2240_v39 = vld [vmem:[%s2401_s15] ss:$0 sm:$0xff] }
 0x48e   :  { %v391_v45 = vrot.slane %v390_v44, 2 }
 0x490   :  { %v392_v47 = vadd.f32 %v391_v45, %v390_v44 }
 0x492   :  { %v393_v31 = vrot.slane %v392_v47, 1 }
 0x494   :  { %v394_v48 = vadd.f32 %v393_v31, %v392_v47 }
 0x496   :  { %v414_v50 = vsel %vm255_vm4, %v401_v49, %v394_v48 }
 0x497   :  { %1510 = vmatmul.msk.f32.vlgmr.msra.gmra.mxu0 %vm201_vm0, %v414_v50 }
 0x498   :  { %836 = vmatpush.msra.mxu0 %v2188_v26 }
 0x49a   :  { %837 = vmatpush.msra.mxu0 %v2192_v33 }
 0x49c   :  { %838 = vmatpush.msra.mxu0 %v2196_v27 }
 0x49e   :  { %839 = vmatpush.msra.mxu0 %v2202_v28 }
 0x4f0   :  { %v2233_v37 = vpop.f32.mrf.mxu1 }
 0x4f4   :  { %v2168_v58 = vpop.f32.mrf.mxu3 }
 0x4f5   :  { %v493_v46 = vadd.f32 %v2175_v61, %v2168_v58 }
 0x4fc   :  { %v2170_v59 = vpop.f32.mrf.mxu3 }
 0x514   :  { %v434_v53 = vpop.f32.mrf.mxu0 }
 0x515   :  { %v435_v57 = vadd.f32 %v1573_v51, %v434_v53 }
 0x517   :  { %1516 = vmatmul.msk.f32.vlgmr.msra.gmra.mxu3 %vm446_vm8, %v435_v57  ;;  %1518 = vmatmul.msk.f32.vlgmr.msrb.gmra.mxu0 %vm446_vm8, %v435_v57 }
 0x518   :  { %984 = vmatpush.msra.mxu3 %v2188_v26  ;;  %1047 = vmatpush.msrb.mxu0 %v2131_v29 }
 0x51a   :  { %985 = vmatpush.msra.mxu3 %v2192_v33  ;;  %1048 = vmatpush.msrb.mxu0 %v2134_v34 }
 0x51c   :  { %986 = vmatpush.msra.mxu3 %v2196_v27  ;;  %1049 = vmatpush.msrb.mxu0 %v2137_v36 }
 0x51e   :  { %987 = vmatpush.msra.mxu3 %v2202_v28  ;;  %1050 = vmatpush.msrb.mxu0 %v2151_v54 }
 0x594   :  { %v664_v41 = vpop.f32.mrf.mxu0 }
 0x59a   :  { %v603_v63 = vpop.f32.mrf.mxu3 }
 0x59b   :  { %v606_v0 = vadd.f32 %v603_v63, %v468_v62 }
 0x59d   :  { %1589 = vtanh.f32 %v606_v0  ;;  %v1517_v2 = vmul.f32 -1.442695, %v606_v0 }
 0x59f   :  { %1591 = vpow2.f32 %v1517_v2 }
 0x5a3   :  { %v1590_v1 = vpop.eup %1589 }
 0x5a4   :  { %632 = vrot.lane.b32.xlu0 %v1590_v1, %s1884_s9 }
 0x5a5   :  { %v1592_v3 = vpop.eup %1591 }
 0x5a6   :  { %v610_v4 = vadd.f32 1.0, %v1592_v3 }
 0x5a8   :  { %1593 = vrcp.f32 %v610_v4  ;;  %v622_v10 = vand.u32 2147483648, %v610_v4  ;;  %vm616_vm4 = vweird.f32 %v610_v4  ;;  %v620_v11 = vand.u32 2147483647, %v610_v4 }
 0x5aa   :  { %v623_v13 = vor.u32 1.1754944e-38, %v622_v10  ;;  %vm621_vm10 = vcmp.eq.f32.partialorder %v620_v11, 8.507059e+37 }
 0x5ac   :  { %627 = vrot.lane.b32.xlu0 %v435_v57, %s1877_s22 }
 0x5ae   :  { %v1594_v5 = vpop.eup %1593 }
 0x5af   :  { %v612_v6 = vmul.f32 %v1594_v5, %v610_v4  ;;  %vm617_vm0 = vweird.f32 %v1594_v5 }
 0x5b0   :  { %vm618_vm9 = vmor %vm616_vm4, %vm617_vm0 }
 0x5b1   :  { %v613_v7 = vsub.f32 1.0, %v612_v6 }
 0x5b3   :  { %v614_v8 = vmul.f32 %v1594_v5, %v613_v7 }
 0x5b5   :  { %v615_v9 = vadd.f32 %v1594_v5, %v614_v8 }
 0x5b7   :  { %v619_v12 = vsel %vm618_vm9, %v1594_v5, %v615_v9 }
 0x5b8   :  { %v624_v15 = vsel %vm621_vm10, %v623_v13, %v619_v12 }
 0x616   :  { %v633_v14 = vpop.permute.xlu0 %632 }
 0x617   :  { %v635_v16 = vmul.f32 %v633_v14, %v624_v15 }
 0x619   :  { %637 = vrot.lane.b32.xlu1 %v635_v16, %s1877_s22 }
 0x61e   :  { %v2181_v17 = vpop.permute.xlu0 %627 }
 0x61f   :  { %v630_v18 = vmul.f32 %v2181_v17, %v624_v15 }
 0x68b   :  { %v638_v19 = vpop.permute.xlu1 %637 }
 0x68c   :  { %v2184_v20 = vadd.f32 %v638_v19, %v630_v18 }
 0x68e   :  { %1595 = vtanh.f32 %v2184_v20 }
 0x694   :  { %v1596_v21 = vpop.eup %1595 }
 0x695   :  { %643 = vrot.lane.b32.xlu0 %v1596_v21, %s1884_s9 }
 0x707   :  { %v644_v30 = vpop.permute.xlu0 %643 }
 0x708   :  { %v646_v32 = vmul.f32 %v644_v30, %v624_v15 }
 0x70a   :  { %668 = vrot.lane.b32.xlu2 %v646_v32, %s1877_s22 }
 0x764   :  { %v669_v35 = vpop.permute.xlu2 %668 }
 0x765   :  { %1519 = vmatmul.msk.f32.vlgmr.msra.gmra.mxu1 %vm446_vm8, %v669_v35  ;;  %1521 = vmatmul.msk.f32.vlgmr.msrb.gmra.mxu2 %vm446_vm8, %v669_v35 }
 0x766   :  { %1132 = vmatpush.msrb.mxu2 %v2188_v26  ;;  %1107 = vmatpush.msra.mxu1 %v2120_v24 }
 0x768   :  { %1133 = vmatpush.msrb.mxu2 %v2192_v33  ;;  %1108 = vmatpush.msra.mxu1 %v2123_v25 }
 0x76a   :  { %1134 = vmatpush.msrb.mxu2 %v2196_v27  ;;  %1109 = vmatpush.msra.mxu1 %v2148_v52 }
 0x76c   :  { %1135 = vmatpush.msrb.mxu2 %v2202_v28  ;;  %1110 = vmatpush.msra.mxu1 %v2153_v55 }
 0x7e2   :  { %v689_v43 = vpop.f32.mrf.mxu1 }
 0x7e3   :  { %v690_v44 = vadd.f32 %v689_v43, %v664_v41 }
 0x7e5   :  { %v695_v45 = vadd.f32 %v2240_v39, %v690_v44 }
 0x7e7   :  { %1597 = vtanh.f32 %v695_v45  ;;  %v1520_v53 = vmul.f32 -1.442695, %v695_v45 }
 0x7e8   :  { %v756_v47 = vpop.f32.mrf.mxu2 }
 0x7e9   :  { %v759_v31 = vadd.f32 %v756_v47, %v493_v46 }
 0x7eb   :  { %1599 = vtanh.f32 %v759_v31  ;;  %v1522_v50 = vmul.f32 -1.442695, %v759_v31 }
 0x7ed   :  { %v1598_v48 = vpop.eup %1597  ;;  %1601 = vpow2.f32 %v1522_v50 }
 0x7ee   :  { %718 = vrot.lane.b32.xlu0 %v1598_v48, %s1884_s9 }
 0x7f1   :  { %v1600_v49 = vpop.eup %1599 }
 0x7f2   :  { %782 = vrot.lane.b32.xlu2 %v1600_v49, %s1884_s9 }
 0x7f3   :  { %v1602_v56 = vpop.eup %1601 }
 0x7f4   :  { %v763_v51 = vadd.f32 1.0, %v1602_v56 }
 0x7f6   :  { %1603 = vrcp.f32 %v763_v51  ;;  %v775_v2 = vand.u32 2147483648, %v763_v51  ;;  %vm769_vm12 = vweird.f32 %v763_v51  ;;  %v773_v3 = vand.u32 2147483647, %v763_v51 }
 0x7f7   :  { %1605 = vpow2.f32 %v1520_v53 }
 0x7f8   :  { %v776_v6 = vor.u32 1.1754944e-38, %v775_v2  ;;  %vm774_vm14 = vcmp.eq.f32.partialorder %v773_v3, 8.507059e+37 }
 0x7fc   :  { %v1604_v57 = vpop.eup %1603 }
 0x7fd   :  { %v765_v60 = vmul.f32 %v1604_v57, %v763_v51  ;;  %v1606_v58 = vpop.eup %1605  ;;  %vm770_vm11 = vweird.f32 %v1604_v57 }
 0x7fe   :  { %v699_v63 = vadd.f32 1.0, %v1606_v58  ;;  %vm771_vm13 = vmor %vm769_vm12, %vm770_vm11 }
 0x7ff   :  { %v766_v62 = vsub.f32 1.0, %v765_v60 }
 0x800   :  { %1607 = vrcp.f32 %v699_v63  ;;  %v711_v14 = vand.u32 2147483648, %v699_v63  ;;  %vm705_vm1 = vweird.f32 %v699_v63  ;;  %v709_v15 = vand.u32 2147483647, %v699_v63 }
 0x801   :  { %v767_v0 = vmul.f32 %v1604_v57, %v766_v62 }
 0x802   :  { %v712_v18 = vor.u32 1.1754944e-38, %v711_v14  ;;  %vm710_vm3 = vcmp.eq.f32.partialorder %v709_v15, 8.507059e+37 }
 0x803   :  { %v768_v1 = vadd.f32 %v1604_v57, %v767_v0 }
 0x805   :  { %v772_v4 = vsel %vm771_vm13, %v1604_v57, %v768_v1 }
 0x806   :  { %v1608_v5 = vpop.eup %1607  ;;  %v777_v8 = vsel %vm774_vm14, %v776_v6, %v772_v4 }
 0x807   :  { %v701_v10 = vmul.f32 %v1608_v5, %v699_v63  ;;  %vm706_vm15 = vweird.f32 %v1608_v5  ;;  %v780_v23 = vmul.f32 %v777_v8, %v2184_v20 }
 0x808   :  { %vm707_vm2 = vmor %vm705_vm1, %vm706_vm15 }
 0x809   :  { %v702_v11 = vsub.f32 1.0, %v701_v10 }
 0x80b   :  { %v703_v12 = vmul.f32 %v1608_v5, %v702_v11 }
 0x80d   :  { %v704_v13 = vadd.f32 %v1608_v5, %v703_v12 }
 0x80f   :  { %v708_v16 = vsel %vm707_vm2, %v1608_v5, %v704_v13 }
 0x810   :  { %v713_v21 = vsel %vm710_vm3, %v712_v18, %v708_v16 }
 0x811   :  { %v716_v41 = vmul.f32 %v713_v21, %v2181_v17 }
 0x84c   :  { %v783_v7 = vpop.permute.xlu2 %782 }
 0x84d   :  { %v785_v9 = vmul.f32 %v783_v7, %v777_v8 }
 0x84f   :  { %787 = vrot.lane.b32.xlu2 %v785_v9, %s1877_s22 }
 0x860   :  { %v719_v19 = vpop.permute.xlu0 %718 }
 0x861   :  { %v721_v22 = vmul.f32 %v719_v19, %v713_v21 }
 0x863   :  { %723 = vrot.lane.b32.xlu0 %v721_v22, %s1877_s22 }
 0x8a9   :  { %v788_v30 = vpop.permute.xlu2 %787 }
 0x8aa   :  { %v2250_v32 = vadd.f32 %v788_v30, %v780_v23 }
 0x8ac   :  { %1609 = vtanh.f32 %v2250_v32 }
 0x8b2   :  { %v1610_v35 = vpop.eup %1609 }
 0x8b3   :  { %793 = vrot.lane.b32.xlu0 %v1610_v35, %s1884_s9 }
 0x8d5   :  { %v724_v43 = vpop.permute.xlu0 %723 }
 0x8d6   :  { %v2255_v44 = vadd.f32 %v724_v43, %v716_v41 }
 0x8d8   :  { %1611 = vtanh.f32 %v2255_v44 }
 0x8de   :  { %v1612_v45 = vpop.eup %1611 }
 0x8df   :  { %729 = vrot.lane.b32.xlu1 %v1612_v45, %s1884_s9 }
 0x925   :  { %v794_v46 = vpop.permute.xlu0 %793 }
 0x926   :  { %v796_v20 = vmul.f32 %v794_v46, %v777_v8 }
 0x928   :  { %820 = vrot.lane.b32.xlu1 %v796_v20, %s1877_s22  ;;  %v543_v20 = vadd.f32 %v2175_v61, %v2233_v37 }
 0x951   :  { %v730_v47 = vpop.permute.xlu1 %729 }
 0x952   :  { %v732_v31 = vmul.f32 %v730_v47, %v713_v21 }
 0x954   :  { %734 = vrot.lane.b32.xlu2 %v732_v31, %s1877_s22 }
 0x99a   :  { %v821_v48 = vpop.permute.xlu1 %820 }
 0x99b   :  { %1524 = vmatmul.msk.f32.vlgmr.msra.gmra.mxu0 %vm446_vm8, %v821_v48  ;;  %1526 = vmatmul.msk.f32.vlgmr.msrb.gmra.mxu1 %vm446_vm8, %v821_v48 }
 0x99c   :  { %1280 = vmatpush.msrb.mxu1 %v2188_v26  ;;  %1255 = vmatpush.msra.mxu0 %v2120_v24  ;;  %v518_v24 = vadd.f32 %v2175_v61, %v2170_v59 }
 0x99e   :  { %1281 = vmatpush.msrb.mxu1 %v2192_v33  ;;  %1256 = vmatpush.msra.mxu0 %v2123_v25 }
 0x9a0   :  { %1282 = vmatpush.msrb.mxu1 %v2196_v27  ;;  %1257 = vmatpush.msra.mxu0 %v2148_v52 }
 0x9a2   :  { %1283 = vmatpush.msrb.mxu1 %v2202_v28  ;;  %1258 = vmatpush.msra.mxu0 %v2153_v55 }
 0x9ae   :  { %v735_v17 = vpop.permute.xlu2 %734 }
 0x9af   :  { %738 = vst.msk [vmem:[#allocation2] sm:$0x3] %vm737_vm5, %v735_v17  ;;  %1523 = vmatmul.msk.f32.vlgmr.msrb.gmra.mxu3 %vm446_vm8, %v735_v17 }
 0x9b0   :  { %1195 = vmatpush.msrb.mxu3 %v2131_v29 }
 0x9b2   :  { %1196 = vmatpush.msrb.mxu3 %v2134_v34 }
 0x9b4   :  { %1197 = vmatpush.msrb.mxu3 %v2137_v36 }
 0x9b6   :  { %1198 = vmatpush.msrb.mxu3 %v2151_v54 }
 0xa18   :  { %v904_v25 = vpop.f32.mrf.mxu1  ;;  %v841_v26 = vpop.f32.mrf.mxu0 }
 0xa19   :  { %v907_v52 = vadd.f32 %v904_v25, %v518_v24 }
 0xa1b   :  { %1613 = vtanh.f32 %v907_v52  ;;  %v1527_v36 = vmul.f32 -1.442695, %v907_v52 }
 0xa21   :  { %v1614_v55 = vpop.eup %1613 }
 0xa22   :  { %930 = vrot.lane.b32.xlu2 %v1614_v55, %s1884_s9 }
 0xa32   :  { %v816_v33 = vpop.f32.mrf.mxu3 }
 0xa33   :  { %v842_v27 = vadd.f32 %v841_v26, %v816_v33 }
 0xa35   :  { %v844_v29 = vadd.f32 %v2240_v39, %v842_v27 }
 0xa37   :  { %1615 = vtanh.f32 %v844_v29  ;;  %v1525_v1 = vmul.f32 -1.442695, %v844_v29 }
 0xa38   :  { %1617 = vpow2.f32 %v1527_v36 }
 0xa3d   :  { %v1616_v34 = vpop.eup %1615 }
 0xa3e   :  { %867 = vrot.lane.b32.xlu0 %v1616_v34, %s1884_s9  ;;  %v1618_v54 = vpop.eup %1617 }
 0xa3f   :  { %v911_v28 = vadd.f32 1.0, %v1618_v54 }
 0xa41   :  { %1619 = vrcp.f32 %v911_v28  ;;  %v923_v53 = vand.u32 2147483648, %v911_v28  ;;  %vm917_vm7 = vweird.f32 %v911_v28  ;;  %v921_v57 = vand.u32 2147483647, %v911_v28 }
 0xa42   :  { %1621 = vpow2.f32 %v1525_v1 }
 0xa43   :  { %v924_v58 = vor.u32 1.1754944e-38, %v923_v53  ;;  %vm922_vm4 = vcmp.eq.f32.partialorder %v921_v57, 8.507059e+37 }
 0xa47   :  { %v1620_v59 = vpop.eup %1619 }
 0xa48   :  { %v913_v49 = vmul.f32 %v1620_v59, %v911_v28  ;;  %vm918_vm6 = vweird.f32 %v1620_v59  ;;  %v1622_v2 = vpop.eup %1621 }
 0xa49   :  { %vm919_vm0 = vmor %vm917_vm7, %vm918_vm6  ;;  %v848_v3 = vadd.f32 1.0, %v1622_v2 }
 0xa4a   :  { %v914_v50 = vsub.f32 1.0, %v913_v49 }
 0xa4b   :  { %1623 = vrcp.f32 %v848_v3  ;;  %v860_v9 = vand.u32 2147483648, %v848_v3  ;;  %vm854_vm10 = vweird.f32 %v848_v3  ;;  %v858_v10 = vand.u32 2147483647, %v848_v3 }
 0xa4c   :  { %v915_v56 = vmul.f32 %v1620_v59, %v914_v50 }
 0xa4d   :  { %v861_v12 = vor.u32 1.1754944e-38, %v860_v9  ;;  %vm859_vm12 = vcmp.eq.f32.partialorder %v858_v10, 8.507059e+37 }
 0xa4e   :  { %v916_v51 = vadd.f32 %v1620_v59, %v915_v56 }
 0xa50   :  { %v920_v60 = vsel %vm919_vm0, %v1620_v59, %v916_v51 }
 0xa51   :  { %v925_v63 = vsel %vm922_vm4, %v924_v58, %v920_v60  ;;  %v1624_v4 = vpop.eup %1623 }
 0xa52   :  { %v850_v5 = vmul.f32 %v1624_v4, %v848_v3  ;;  %vm855_vm9 = vweird.f32 %v1624_v4  ;;  %v928_v16 = vmul.f32 %v925_v63, %v2250_v32 }
 0xa53   :  { %vm856_vm11 = vmor %vm854_vm10, %vm855_vm9 }
 0xa54   :  { %v851_v6 = vsub.f32 1.0, %v850_v5 }
 0xa56   :  { %v852_v7 = vmul.f32 %v1624_v4, %v851_v6 }
 0xa58   :  { %v853_v8 = vadd.f32 %v1624_v4, %v852_v7 }
 0xa5a   :  { %v857_v11 = vsel %vm856_vm11, %v1624_v4, %v853_v8 }
 0xa5b   :  { %v862_v14 = vsel %vm859_vm12, %v861_v12, %v857_v11 }
 0xa5c   :  { %v865_v22 = vmul.f32 %v862_v14, %v2255_v44 }
 0xa7c   :  { %v931_v62 = vpop.permute.xlu2 %930 }
 0xa7d   :  { %v933_v0 = vmul.f32 %v931_v62, %v925_v63 }
 0xa7f   :  { %935 = vrot.lane.b32.xlu0 %v933_v0, %s1877_s22 }
 0xab0   :  { %v868_v13 = vpop.permute.xlu0 %867 }
 0xab1   :  { %v870_v15 = vmul.f32 %v868_v13, %v862_v14 }
 0xab3   :  { %872 = vrot.lane.b32.xlu1 %v870_v15, %s1877_s22 }
 0xaf1   :  { %v936_v18 = vpop.permute.xlu0 %935 }
 0xaf2   :  { %v2285_v19 = vadd.f32 %v936_v18, %v928_v16 }
 0xaf4   :  { %1625 = vtanh.f32 %v2285_v19 }
 0xafa   :  { %v1626_v21 = vpop.eup %1625 }
 0xafb   :  { %941 = vrot.lane.b32.xlu1 %v1626_v21, %s1884_s9 }
 0xb25   :  { %v873_v23 = vpop.permute.xlu1 %872 }
 0xb26   :  { %v2290_v30 = vadd.f32 %v873_v23, %v865_v22 }
 0xb28   :  { %1627 = vtanh.f32 %v2290_v30 }
 0xb2e   :  { %v1628_v35 = vpop.eup %1627 }
 0xb2f   :  { %878 = vrot.lane.b32.xlu2 %v1628_v35, %s1884_s9 }
 0xb6d   :  { %v942_v41 = vpop.permute.xlu1 %941 }
 0xb6e   :  { %v944_v32 = vmul.f32 %v942_v41, %v925_v63  ;;  %v568_v41 = vadd.f32 %v2175_v61, %v2235_v38 }
 0xb70   :  { %968 = vrot.lane.b32.xlu2 %v944_v32, %s1877_s22 }
 0xb89   :  { %v879_v43 = vpop.permute.xlu2 %878 }
 0xb8a   :  { %v881_v45 = vmul.f32 %v879_v43, %v862_v14 }
 0xb8c   :  { %883 = vrot.lane.b32.xlu0 %v881_v45, %s1877_s22 }
 0xbca   :  { %v969_v46 = vpop.permute.xlu2 %968 }
 0xbcb   :  { %1529 = vmatmul.msk.f32.vlgmr.msra.gmra.mxu3 %vm446_vm8, %v969_v46  ;;  %1531 = vmatmul.msk.f32.vlgmr.msrb.gmra.mxu0 %vm446_vm8, %v969_v46 }
 0xbfe   :  { %v884_v44 = vpop.permute.xlu0 %883 }
 0xbff   :  { %886 = vst.msk [vmem:[#allocation2 + $0x2] sm:$0x3] %vm737_vm5, %v884_v44  ;;  %1528 = vmatmul.msk.f32.vlgmr.msra.gmra.mxu2 %vm446_vm8, %v884_v44 }
 0xc48   :  { %v1052_v47 = vpop.f32.mrf.mxu0 }
 0xc49   :  { %v1055_v31 = vadd.f32 %v1052_v47, %v543_v20 }
 0xc4b   :  { %1629 = vtanh.f32 %v1055_v31  ;;  %v1532_v26 = vmul.f32 -1.442695, %v1055_v31 }
 0xc4e   :  { %v989_v17 = vpop.f32.mrf.mxu3 }
 0xc51   :  { %v1630_v48 = vpop.eup %1629 }
 0xc52   :  { %1078 = vrot.lane.b32.xlu1 %v1630_v48, %s1884_s9 }
 0xc82   :  { %v964_v24 = vpop.f32.mrf.mxu2 }
 0xc83   :  { %v990_v25 = vadd.f32 %v989_v17, %v964_v24 }
 0xc85   :  { %v992_v52 = vadd.f32 %v2240_v39, %v990_v25 }
 0xc87   :  { %1631 = vtanh.f32 %v992_v52  ;;  %v1530_v57 = vmul.f32 -1.442695, %v992_v52 }
 0xc88   :  { %1633 = vpow2.f32 %v1532_v26 }
 0xc8d   :  { %v1632_v55 = vpop.eup %1631 }
 0xc8e   :  { %1015 = vrot.lane.b32.xlu0 %v1632_v55, %s1884_s9  ;;  %v1634_v33 = vpop.eup %1633 }
 0xc8f   :  { %v1059_v27 = vadd.f32 1.0, %v1634_v33 }
 0xc91   :  { %1635 = vrcp.f32 %v1059_v27  ;;  %v1071_v28 = vand.u32 2147483648, %v1059_v27  ;;  %vm1065_vm14 = vweird.f32 %v1059_v27  ;;  %v1069_v59 = vand.u32 2147483647, %v1059_v27 }
 0xc92   :  { %1637 = vpow2.f32 %v1530_v57 }
 0xc93   :  { %v1072_v50 = vor.u32 1.1754944e-38, %v1071_v28  ;;  %vm1070_vm1 = vcmp.eq.f32.partialorder %v1069_v59, 8.507059e+37 }
 0xc97   :  { %v1636_v37 = vpop.eup %1635 }
 0xc98   :  { %v1061_v29 = vmul.f32 %v1636_v37, %v1059_v27  ;;  %vm1066_vm13 = vweird.f32 %v1636_v37  ;;  %v1638_v60 = vpop.eup %1637 }
 0xc99   :  { %vm1067_vm15 = vmor %vm1065_vm14, %vm1066_vm13  ;;  %v996_v58 = vadd.f32 1.0, %v1638_v60 }
 0xc9a   :  { %v1062_v34 = vsub.f32 1.0, %v1061_v29 }
 0xc9b   :  { %1639 = vrcp.f32 %v996_v58  ;;  %v1008_v3 = vand.u32 2147483648, %v996_v58  ;;  %vm1002_vm3 = vweird.f32 %v996_v58  ;;  %v1006_v4 = vand.u32 2147483647, %v996_v58 }
 0xc9c   :  { %v1063_v36 = vmul.f32 %v1636_v37, %v1062_v34 }
 0xc9d   :  { %v1009_v6 = vor.u32 1.1754944e-38, %v1008_v3  ;;  %vm1007_vm7 = vcmp.eq.f32.partialorder %v1006_v4, 8.507059e+37 }
 0xc9e   :  { %v1064_v54 = vadd.f32 %v1636_v37, %v1063_v36 }
 0xca0   :  { %v1068_v49 = vsel %vm1067_vm15, %v1636_v37, %v1064_v54 }
 0xca1   :  { %v1073_v51 = vsel %vm1070_vm1, %v1072_v50, %v1068_v49  ;;  %v1640_v62 = vpop.eup %1639 }
 0xca2   :  { %v998_v63 = vmul.f32 %v1640_v62, %v996_v58  ;;  %vm1003_vm2 = vweird.f32 %v1640_v62  ;;  %v1076_v10 = vmul.f32 %v1073_v51, %v2285_v19 }
 0xca3   :  { %vm1004_vm6 = vmor %vm1002_vm3, %vm1003_vm2 }
 0xca4   :  { %v999_v0 = vsub.f32 1.0, %v998_v63 }
 0xca6   :  { %v1000_v1 = vmul.f32 %v1640_v62, %v999_v0 }
 0xca8   :  { %v1001_v2 = vadd.f32 %v1640_v62, %v1000_v1 }
 0xcaa   :  { %v1005_v5 = vsel %vm1004_vm6, %v1640_v62, %v1001_v2  ;;  %vm1376_vm6 = vcmask 1041408  }
 0xcab   :  { %v1010_v8 = vsel %vm1007_vm7, %v1009_v6, %v1005_v5 }
 0xcac   :  { %v1013_v14 = vmul.f32 %v1010_v8, %v2290_v30 }
 0xcc4   :  { %v1079_v56 = vpop.permute.xlu1 %1078 }
 0xcc5   :  { %v1081_v53 = vmul.f32 %v1079_v56, %v1073_v51 }
 0xcc7   :  { %1083 = vrot.lane.b32.xlu2 %v1081_v53, %s1877_s22 }
 0xd00   :  { %v1016_v7 = vpop.permute.xlu0 %1015 }
 0xd01   :  { %v1018_v9 = vmul.f32 %v1016_v7, %v1010_v8 }
 0xd03   :  { %1020 = vrot.lane.b32.xlu1 %v1018_v9, %s1877_s22 }
 0xd21   :  { %v1084_v11 = vpop.permute.xlu2 %1083 }
 0xd22   :  { %v2308_v12 = vadd.f32 %v1084_v11, %v1076_v10 }
 0xd24   :  { %1641 = vtanh.f32 %v2308_v12 }
 0xd2a   :  { %v1642_v13 = vpop.eup %1641 }
 0xd2b   :  { %1089 = vrot.lane.b32.xlu0 %v1642_v13, %s1884_s9 }
 0xd75   :  { %v1021_v15 = vpop.permute.xlu1 %1020 }
 0xd76   :  { %v2313_v16 = vadd.f32 %v1021_v15, %v1013_v14  ;;  %v1336_v15 = vld [vmem:[#allocation15 + $0x18] sm:$0xff] }
 0xd77   :  { %1359 = vmatpush.msra.mxu2 %v1336_v15 }
 0xd78   :  { %1643 = vtanh.f32 %v2313_v16 }
 0xd7e   :  { %v1644_v18 = vpop.eup %1643 }
 0xd7f   :  { %1026 = vrot.lane.b32.xlu2 %v1644_v18, %s1884_s9  ;;  %v1335_v18 = vld [vmem:[#allocation15 + $0x10] sm:$0xff] }
 0xd80   :  { %1360 = vmatpush.msra.mxu2 %v1335_v18 }
 0xd9d   :  { %v1090_v21 = vpop.permute.xlu0 %1089 }
 0xd9e   :  { %v1092_v19 = vmul.f32 %v1090_v21, %v1073_v51  ;;  %v1333_v21 = vld [vmem:[#allocation15] sm:$0xff] }
 0xda0   :  { %1116 = vrot.lane.b32.xlu1 %v1092_v19, %s1877_s22 }
 0xdd9   :  { %v1027_v22 = vpop.permute.xlu2 %1026 }
 0xdda   :  { %v1029_v23 = vmul.f32 %v1027_v22, %v1010_v8 }
 0xddc   :  { %1031 = vrot.lane.b32.xlu0 %v1029_v23, %s1877_s22 }
 0xe12   :  { %v1117_v35 = vpop.permute.xlu1 %1116 }
 0xe13   :  { %1534 = vmatmul.msk.f32.vlgmr.msrb.gmra.mxu2 %vm446_vm8, %v1117_v35  ;;  %1536 = vmatmul.msk.f32.vlgmr.msrb.gmra.mxu3 %vm446_vm8, %v1117_v35 }
 0xe4e   :  { %v1032_v30 = vpop.permute.xlu0 %1031 }
 0xe4f   :  { %1034 = vst.msk [vmem:[#allocation2 + $0x4] sm:$0x3] %vm737_vm5, %v1032_v30  ;;  %1533 = vmatmul.msk.f32.vlgmr.msra.gmra.mxu1 %vm446_vm8, %v1032_v30 }
 0xe96   :  { %v1200_v32 = vpop.f32.mrf.mxu3  ;;  %v1137_v46 = vpop.f32.mrf.mxu2 }
 0xe97   :  { %v1203_v43 = vadd.f32 %v1200_v32, %v568_v41 }
 0xe99   :  { %1645 = vtanh.f32 %v1203_v43  ;;  %v1537_v48 = vmul.f32 -1.442695, %v1203_v43  ;;  %v1576_v43 = vld [vmem:[%s2403_s17] ss:$0 sm:$0xff] }
 0xe9f   :  { %v1646_v45 = vpop.eup %1645 }
 0xea0   :  { %1226 = vrot.lane.b32.xlu1 %v1646_v45, %s1884_s9 }
 0xecc   :  { %v1112_v44 = vpop.f32.mrf.mxu1 }
 0xecd   :  { %v1138_v20 = vadd.f32 %v1137_v46, %v1112_v44 }
 0xecf   :  { %v1140_v47 = vadd.f32 %v2240_v39, %v1138_v20 }
 0xed1   :  { %1647 = vtanh.f32 %v1140_v47  ;;  %v1535_v52 = vmul.f32 -1.442695, %v1140_v47 }
 0xed2   :  { %1649 = vpow2.f32 %v1537_v48 }
 0xed7   :  { %v1648_v31 = vpop.eup %1647 }
 0xed8   :  { %1163 = vrot.lane.b32.xlu2 %v1648_v31, %s1884_s9  ;;  %v1650_v17 = vpop.eup %1649 }
 0xed9   :  { %v1207_v24 = vadd.f32 1.0, %v1650_v17 }
 0xedb   :  { %1651 = vrcp.f32 %v1207_v24  ;;  %v1219_v33 = vand.u32 2147483648, %v1207_v24  ;;  %vm1213_vm4 = vweird.f32 %v1207_v24  ;;  %v1217_v27 = vand.u32 2147483647, %v1207_v24 }
 0xedc   :  { %1653 = vpow2.f32 %v1535_v52 }
 0xedd   :  { %v1220_v34 = vor.u32 1.1754944e-38, %v1219_v33  ;;  %vm1218_vm10 = vcmp.eq.f32.partialorder %v1217_v27, 8.507059e+37 }
 0xee1   :  { %v1652_v61 = vpop.eup %1651 }
 0xee2   :  { %v1209_v38 = vmul.f32 %v1652_v61, %v1207_v24  ;;  %vm1214_vm0 = vweird.f32 %v1652_v61  ;;  %v1654_v37 = vpop.eup %1653 }
 0xee3   :  { %vm1215_vm9 = vmor %vm1213_vm4, %vm1214_vm0  ;;  %v1144_v36 = vadd.f32 1.0, %v1654_v37  ;;  %vm1424_vm0 = vcmask 7168  }
 0xee4   :  { %v1210_v25 = vsub.f32 1.0, %v1209_v38 }
 0xee5   :  { %1655 = vrcp.f32 %v1144_v36  ;;  %v1156_v57 = vand.u32 2147483648, %v1144_v36  ;;  %vm1150_vm12 = vweird.f32 %v1144_v36  ;;  %v1154_v60 = vand.u32 2147483647, %v1144_v36 }
 0xee6   :  { %v1211_v55 = vmul.f32 %v1652_v61, %v1210_v25 }
 0xee7   :  { %v1157_v62 = vor.u32 1.1754944e-38, %v1156_v57  ;;  %vm1155_vm14 = vcmp.eq.f32.partialorder %v1154_v60, 8.507059e+37 }
 0xee8   :  { %v1212_v26 = vadd.f32 %v1652_v61, %v1211_v55 }
 0xeea   :  { %v1216_v29 = vsel %vm1215_vm9, %v1652_v61, %v1212_v26  ;;  %vm1426_vm9 = vcmask 1024  }
 0xeeb   :  { %v1221_v28 = vsel %vm1218_vm10, %v1220_v34, %v1216_v29  ;;  %v1656_v49 = vpop.eup %1655 }
 0xeec   :  { %v1146_v50 = vmul.f32 %v1656_v49, %v1144_v36  ;;  %vm1151_vm11 = vweird.f32 %v1656_v49  ;;  %v1224_v2 = vmul.f32 %v1221_v28, %v2308_v12  ;;  %v2354_v36 = vld [vmem:[%s2393_s7 + $0x8] sm:$0x3] }
 0xeed   :  { %vm1152_vm13 = vmor %vm1150_vm12, %vm1151_vm11  ;;  %vm1415_vm4 = vcmp.ne.s32.totalorder %v2354_v36, 0 }
 0xeee   :  { %v1147_v56 = vsub.f32 1.0, %v1146_v50 }
 0xef0   :  { %v1148_v51 = vmul.f32 %v1656_v49, %v1147_v56 }
 0xef2   :  { %v1149_v53 = vadd.f32 %v1656_v49, %v1148_v51 }
 0xef4   :  { %v1153_v58 = vsel %vm1152_vm13, %v1656_v49, %v1149_v53 }
 0xef5   :  { %v1158_v0 = vsel %vm1155_vm14, %v1157_v62, %v1153_v58  ;;  %vm1460_vm14 = vcmask 0  }
 0xef6   :  { %v1161_v6 = vmul.f32 %v1158_v0, %v2313_v16  ;;  %v1334_v16 = vld [vmem:[#allocation15 + $0x8] sm:$0xff] }
 0xef7   :  { %1361 = vmatpush.msra.mxu2 %v1334_v16 }
 0xef9   :  { %1362 = vmatpush.msra.mxu2 %v1333_v21 }
 0xf12   :  { %v1227_v54 = vpop.permute.xlu1 %1226 }
 0xf13   :  { %v1229_v59 = vmul.f32 %v1227_v54, %v1221_v28 }
 0xf15   :  { %1231 = vrot.lane.b32.xlu2 %v1229_v59, %s1877_s22 }
 0xf32   :  { %v1164_v63 = vpop.permute.xlu2 %1163 }
 0xf33   :  { %v1166_v1 = vmul.f32 %v1164_v63, %v1158_v0 }
 0xf35   :  { %1168 = vrot.lane.b32.xlu0 %v1166_v1, %s1877_s22 }
 0xf6f   :  { %v1232_v3 = vpop.permute.xlu2 %1231 }
 0xf70   :  { %v1234_v4 = vadd.f32 %v1232_v3, %v1224_v2  ;;  %v1372_v3 = vld [vmem:[%s2393_s7] sm:$0xff] }
 0xf71   :  { %vm1414_vm7 = vcmp.ne.s32.totalorder %v1372_v3, 0 }
 0xf72   :  { %1657 = vtanh.f32 %v1234_v4 }
 0xf78   :  { %v1658_v5 = vpop.eup %1657 }
 0xf79   :  { %1237 = vrot.lane.b32.xlu0 %v1658_v5, %s1884_s9 }
 0xfa7   :  { %v1169_v7 = vpop.permute.xlu0 %1168 }
 0xfa8   :  { %v1171_v8 = vadd.f32 %v1169_v7, %v1161_v6 }
 0xfaa   :  { %1659 = vtanh.f32 %v1171_v8 }
 0xfb0   :  { %v1660_v9 = vpop.eup %1659 }
 0xfb1   :  { %1174 = vrot.lane.b32.xlu1 %v1660_v9, %s1884_s9 }
 0xfeb   :  { %v1238_v10 = vpop.permute.xlu0 %1237 }
 0xfec   :  { %v1240_v11 = vmul.f32 %v1238_v10, %v1221_v28 }
 0xfee   :  { %1264 = vrot.lane.b32.xlu1 %v1240_v11, %s1877_s22 }
0x1023   :  { %v1175_v13 = vpop.permute.xlu1 %1174 }
0x1024   :  { %v1177_v12 = vmul.f32 %v1175_v13, %v1158_v0 }
0x1026   :  { %1179 = vrot.lane.b32.xlu2 %v1177_v12, %s1877_s22 }
0x1060   :  { %v1265_v14 = vpop.permute.xlu1 %1264 }
0x1061   :  { %1539 = vmatmul.msk.f32.vlgmr.msrb.gmra.mxu1 %vm446_vm8, %v1265_v14 }
0x1080   :  { %v1180_v19 = vpop.permute.xlu2 %1179 }
0x1081   :  { %1182 = vst.msk [vmem:[#allocation2 + $0x6] sm:$0x3] %vm737_vm5, %v1180_v19  ;;  %1538 = vmatmul.msk.f32.vlgmr.msra.gmra.mxu0 %vm446_vm8, %v1180_v19  ;;  %v1543_v19 = vsel %vm1414_vm7, 1.0, %v1883_v42 }
0x1088   :  { %v1331_v22 = vld [vmem:[#allocation2] sm:$0xff] }
0x1089   :  { %1541 = vmatmul.msk.f32.vlgmr.msra.gmra.mxu2 %vm446_vm8, %v1331_v22  ;;  %v1544_v22 = vsel %vm1415_vm4, 1.0, %v1883_v42 }
0x10de   :  { %v1285_v23 = vpop.f32.mrf.mxu1 }
0x10fe   :  { %v1260_v35 = vpop.f32.mrf.mxu0 }
0x10ff   :  { %v1286_v30 = vadd.f32 %v1285_v23, %v1260_v35  ;;  %v1436_v23 = vsel %vm1426_vm9, %v1544_v22, 0.0 }
0x1101   :  { %v1288_v41 = vadd.f32 %v2240_v39, %v1286_v30 }
0x1103   :  { %1661 = vtanh.f32 %v1288_v41  ;;  %v1540_v44 = vmul.f32 -1.442695, %v1288_v41 }
0x1105   :  { %1663 = vpow2.f32 %v1540_v44 }
0x1109   :  { %v1662_v32 = vpop.eup %1661 }
0x110a   :  { %1311 = vrot.lane.b32.xlu0 %v1662_v32, %s1884_s9 }
0x110b   :  { %v1664_v20 = vpop.eup %1663 }
0x110c   :  { %v1364_v45 = vpop.f32.mrf.mxu2  ;;  %v1292_v47 = vadd.f32 1.0, %v1664_v20 }
0x110d   :  { %v2345_v46 = vadd.f32 %v1576_v43, %v1364_v45 }
0x110e   :  { %1665 = vrcp.f32 %v1292_v47  ;;  %v1304_v61 = vand.u32 2147483648, %v1292_v47  ;;  %vm1298_vm1 = vweird.f32 %v1292_v47  ;;  %v1302_v38 = vand.u32 2147483647, %v1292_v47 }
0x110f   :  { %1370 = vst [vmem:[#allocation16] sm:$0xff] %v2345_v46 }
0x1110   :  { %v1305_v52 = vor.u32 1.1754944e-38, %v1304_v61  ;;  %vm1303_vm3 = vcmp.eq.f32.partialorder %v1302_v38, 8.507059e+37 }
0x1114   :  { %v1666_v31 = vpop.eup %1665 }
0x1115   :  { %v1294_v39 = vmul.f32 %v1666_v31, %v1292_v47  ;;  %vm1299_vm15 = vweird.f32 %v1666_v31 }
0x1116   :  { %vm1300_vm2 = vmor %vm1298_vm1, %vm1299_vm15 }
0x1117   :  { %v1295_v48 = vsub.f32 1.0, %v1294_v39 }
0x1119   :  { %v1296_v17 = vmul.f32 %v1666_v31, %v1295_v48 }
0x111b   :  { %v1297_v24 = vadd.f32 %v1666_v31, %v1296_v17 }
0x111d   :  { %v1301_v25 = vsel %vm1300_vm2, %v1666_v31, %v1297_v24 }
0x111e   :  { %v1306_v26 = vsel %vm1303_vm3, %v1305_v52, %v1301_v25 }
0x111f   :  { %v1309_v27 = vmul.f32 %v1306_v26, %v1171_v8 }
0x117c   :  { %v1312_v55 = vpop.permute.xlu0 %1311 }
0x117d   :  { %v1314_v33 = vmul.f32 %v1312_v55, %v1306_v26 }
0x117f   :  { %1316 = vrot.lane.b32.xlu2 %v1314_v33, %s1877_s22 }
0x11d9   :  { %v1317_v37 = vpop.permute.xlu2 %1316 }
0x11da   :  { %v1319_v29 = vadd.f32 %v1317_v37, %v1309_v27 }
0x11dc   :  { %1667 = vtanh.f32 %v1319_v29 }
0x11e2   :  { %v1668_v34 = vpop.eup %1667 }
0x11e3   :  { %1322 = vrot.lane.b32.xlu1 %v1668_v34, %s1884_s9 }
0x120d   :  { %1374 = vmax.xlane.f32.xlu1 %v2345_v46 }
0x1226   :  { %1403 = vperm.xlu1 %1570, %v2354_v36  }
0x1255   :  { %v1323_v54 = vpop.permute.xlu1 %1322 }
0x1256   :  { %v1325_v28 = vmul.f32 %v1323_v54, %v1306_v26 }
0x1258   :  { %1327 = vrot.lane.b32.xlu0 %v1325_v28, %s1877_s22 }
0x1280   :  { %v1375_v50 = vpop.xlane.xlu1 %1374 }
0x1281   :  { %v1380_v56 = vsub.f32 %v2345_v46, %v1375_v50 }
0x1283   :  { %v1382_v53 = vmul.f32 1.442695, %v1380_v56 }
0x1285   :  { %1669 = vpow2.f32 %v1382_v53 }
0x128b   :  { %v1670_v58 = vpop.eup %1669 }
0x1298   :  { %v1404_v15 = vpop.permute.xlu1 %1403 }
0x12ca   :  { %v1328_v59 = vpop.permute.xlu0 %1327 }
0x12cb   :  { %1330 = vst.msk [vmem:[#allocation2 + $0x8] sm:$0x3] %vm737_vm5, %v1328_v59  ;;  %vm1406_vm5 = vcmp.eq.s32.totalorder %v2060_v40, %v1404_v15 }
0x12d2   :  { %v1332_v49 = vld [vmem:[#allocation2 + $0x8] sm:$0x3] }
0x12d3   :  { %1542 = vmatmul.msk.f32.gmra.mxu2 %vm446_vm8, %v1332_v49 }
0x1356   :  { %v1367_v51 = vpop.f32.mrf.mxu2 }
0x1357   :  { %v1368_v57 = vadd.f32 %v1576_v43, %v1367_v51 }
0x1359   :  { %1371 = vst [vmem:[#allocation16 + $0x8] sm:$0x3] %v1368_v57  ;;  %v1377_v60 = vsel %vm1376_vm6, %v1368_v57, -inf }
0x135a   :  { %1378 = vmax.xlane.f32.xlu2 %v1377_v60  ;;  %1474 = dma.vmem_to_hbm [thread:$0]  %s1467_s27, 256, %s1469_s1, [#allocation7], %s1872_s24, %s1872_s24, %s1873_s25  }
0x135b   :  { %s1480_s24 = sshll.u32 %s1886_s18, 4  ;;  %s1481_s24 = int_to_ptr.vmem [resolvable:$true] %s1480_s24 }
0x1362   :  { %1386 = vadd.xlane.f32.xlu2 %v1670_v58 }
0x13cd   :  { %v1379_v62 = vpop.xlane.xlu2 %1378 }
0x13ce   :  { %v1381_v63 = vsub.f32 %v1368_v57, %v1379_v62 }
0x13d0   :  { %v1384_v0 = vmul.f32 1.442695, %v1381_v63 }
0x13d2   :  { %1671 = vpow2.f32 %v1384_v0 }
0x13d5   :  { %v1387_v4 = vpop.xlane.xlu2 %1386 }
0x13d6   :  { %1673 = vlog2.f32 %v1387_v4 }
0x13d8   :  { %v1672_v1 = vpop.eup %1671 }
0x13d9   :  { %v1388_v2 = vsel %vm1376_vm6, %v1672_v1, 0.0 }
0x13da   :  { %1389 = vadd.xlane.f32.xlu0 %v1388_v2 }
0x13dc   :  { %v1674_v6 = vpop.eup %1673 }
0x13dd   :  { %v1392_v8 = vmul.f32 0.6931472, %v1674_v6 }
0x13df   :  { %v1395_v10 = vadd.f32 %v1392_v8, %v1375_v50 }
0x13e1   :  { %v1397_v12 = vsub.f32 %v2345_v46, %v1395_v10 }
0x13ee   :  { %1400 = vperm.xlu0 %1571, %v1372_v3  }
0x144d   :  { %v1390_v5 = vpop.xlane.xlu0 %1389 }
0x144e   :  { %1675 = vlog2.f32 %v1390_v5 }
0x1454   :  { %v1676_v7 = vpop.eup %1675 }
0x1455   :  { %v1394_v9 = vmul.f32 0.6931472, %v1676_v7 }
0x1457   :  { %v1396_v11 = vadd.f32 %v1394_v9, %v1379_v62 }
0x1459   :  { %v1398_v18 = vsub.f32 %v1368_v57, %v1396_v11 }
0x145b   :  { %v1408_v16 = vsel %vm1406_vm5, %v1398_v18, 0.0 }
0x145c   :  { %v1411_v21 = vsel %vm1376_vm6, %v1408_v16, 0.0 }
0x1460   :  { %v1401_v13 = vpop.permute.xlu0 %1400 }
0x1461   :  { %vm1405_vm8 = vcmp.eq.s32.totalorder %v2060_v40, %v1401_v13  ;;  %v1435_v40 = vsel %vm1424_vm0, %v1543_v19, 0.0 }
0x1462   :  { %v1407_v14 = vsel %vm1405_vm8, %v1397_v12, 0.0  ;;  %v1437_v35 = vadd.f32 %v1436_v23, %v1435_v40 }
0x1463   :  { %1409 = vadd.xlane.f32.xlu2 %v1407_v14 }
0x1464   :  { %v1438_v30 = vrot.slane %v1437_v35, 4 }
0x1466   :  { %v1439_v41 = vadd.f32 %v1438_v30, %v1437_v35 }
0x1468   :  { %v1440_v32 = vrot.slane %v1439_v41, 2 }
0x146a   :  { %v1441_v43 = vadd.f32 %v1440_v32, %v1439_v41 }
0x146b   :  { %1412 = vadd.xlane.f32.xlu2 %v1411_v21 }
0x146c   :  { %v1442_v45 = vrot.slane %v1441_v43, 1 }
0x146e   :  { %v1443_v46 = vadd.f32 %v1442_v45, %v1441_v43 }
0x1470   :  { %v1444_v44 = vmax.f32 %v1443_v46, 1.0 }
0x1472   :  { %1677 = vrcp.f32 %v1444_v44  ;;  %vm1450_vm10 = vweird.f32 %v1444_v44  ;;  %v1456_v33 = vand.u32 2147483648, %v1444_v44  ;;  %v1454_v29 = vand.u32 2147483647, %v1444_v44 }
0x1474   :  { %v1457_v36 = vor.u32 1.1754944e-38, %v1456_v33  ;;  %vm1455_vm13 = vcmp.eq.f32.partialorder %v1454_v29, 8.507059e+37 }
0x1478   :  { %v1678_v47 = vpop.eup %1677 }
0x1479   :  { %v1446_v39 = vmul.f32 %v1678_v47, %v1444_v44  ;;  %vm1451_vm11 = vweird.f32 %v1678_v47 }
0x147a   :  { %vm1452_vm12 = vmor %vm1450_vm10, %vm1451_vm11 }
0x147b   :  { %v1447_v42 = vsub.f32 1.0, %v1446_v39 }
0x147d   :  { %v1448_v55 = vmul.f32 %v1678_v47, %v1447_v42 }
0x147f   :  { %v1449_v37 = vadd.f32 %v1678_v47, %v1448_v55 }
0x1481   :  { %v1453_v28 = vsel %vm1452_vm12, %v1678_v47, %v1449_v37 }
0x1482   :  { %v1458_v49 = vsel %vm1455_vm13, %v1457_v36, %v1453_v28 }
0x14d6   :  { %v1410_v20 = vpop.xlane.xlu2 %1409 }
0x14d7   :  { %v1420_v31 = vsub.f32 0.0, %v1410_v20 }
0x14d9   :  { %v1422_v17 = vmul.f32 %v1543_v19, %v1420_v31 }
0x14db   :  { %v1425_v38 = vsel %vm1424_vm0, %v1422_v17, 0.0 }
0x14de   :  { %v1413_v48 = vpop.xlane.xlu2 %1412 }
0x14df   :  { %v1421_v24 = vsub.f32 0.0, %v1413_v48 }
0x14e1   :  { %v1423_v61 = vmul.f32 %v1544_v22, %v1421_v24 }
0x14e3   :  { %v1427_v25 = vsel %vm1426_vm9, %v1423_v61, 0.0 }
0x14e4   :  { %v1428_v52 = vadd.f32 %v1427_v25, %v1425_v38 }
0x14e6   :  { %v1429_v26 = vrot.slane %v1428_v52, 4 }
0x14e8   :  { %v1430_v27 = vadd.f32 %v1429_v26, %v1428_v52 }
0x14ea   :  { %v1431_v34 = vrot.slane %v1430_v27, 2 }
0x14ec   :  { %v1432_v54 = vadd.f32 %v1431_v34, %v1430_v27 }
0x14ee   :  { %v1433_v59 = vrot.slane %v1432_v54, 1 }
0x14f0   :  { %v1434_v50 = vadd.f32 %v1433_v59, %v1432_v54 }
0x14f2   :  { %v1459_v56 = vmul.f32 %v1458_v49, %v1434_v50 }
0x14f4   :  { %1461 = vst.msk [vmem:[#allocation17] sm:$0x1] %vm1460_vm14, %v1459_v56 }
0x14f5   :  { %1485 = dma.vmem_to_hbm [thread:$0]  %s1481_s24, 16, %s1483_s21, [#allocation18]  }
0x14f6   :  { %1867 = dma.done.wait [#allocation7], 256  }
0x14f7   :  { %1868 = vsyncadd [#allocation7], 4294967040 }
0x14f8   :  { %1869 = dma.done.wait [#allocation18], 16  }
0x14f9   :  { %1870 = vsyncadd [#allocation18], 4294967280 }
0x14fa   :  { %1494 = vsyncpa [#allocation6], 1 }
0x14fb   :  { %1495 = vsyncpa [#allocation11], 1 }
0x14fc   :  { %1496 = vsyncpa [#allocation14], 1 }
0x14fd   :  { %1497 = vsyncpa [#allocation7], 1 }
0x14fe   :  { %1498 = vsyncpa [#allocation18], 1 }
0x14ff   :  { %1499 = vsyncpa [#allocation8], 1 }

</bundles_post_ra>
